<compile_context>
chip_gen: v7x
topology: tpu7x:2x2x1
jax: 0.10.0
libtpu: 0.0.40
codegen_flags: <defaults>
</compile_context>

<pallas_src>
import math

import jax
import jax.numpy as jnp
from jax import lax
from jax.experimental import pallas as pl
from jax.experimental.pallas import tpu as pltpu


def _round_up(x, m):
    return ((x + m - 1) // m) * m


def make_decoder_kernel(B, S, H, V, T):
    """B, S, H, V are the PADDED sizes (B mult of 8, S mult of 8, H/V mult of 128)."""

    def kernel(dec_init_ref, enc_hid_ref, enc0_ref, mask_add_ref, data0_ref,
               vmask_ref, emb_ref, emb_t_ref, w_ih_ref, w_hh_ref,
               b_ih_ref, b_hh_ref, wg_ref, bg_ref,
               all_out_ref, hid_out_ref,
               hid_scratch, inp_scratch):
        # ---- per-update state init (hidden <- enc_outputs[1], x <- enc_outputs[3][:, u]) ----
        hid_scratch[...] = enc_hid_ref[...]          # (B, H)
        inp_scratch[...] = dec_init_ref[0]           # (B, H)

        enc0 = enc0_ref[...]                         # (B, S, H)
        mask_add = mask_add_ref[...]                 # (B, S)  additive attn mask
        vmask = vmask_ref[...]                       # (1, V)  additive vocab-pad mask
        emb = emb_ref[...]                           # (V, H)  embedding weight
        emb_t = emb_t_ref[...]                       # (H, V)  pre-transposed
        w_ih_t = w_ih_ref[...]                       # (H, 3H) pre-transposed, gates [r,z,n]
        w_hh_t = w_hh_ref[...]                       # (H, 3H)
        b_ih = b_ih_ref[...]                         # (3, H)
        b_hh = b_hh_ref[...]                         # (3, H)
        wg = wg_ref[...]                             # (3, H)  Linear(3H->1) split [h, ctx, x]
        bg = bg_ref[...]                             # (1, 1)

        # ---- loop-invariant hoists (review item 1): built once per grid step ----
        one_hot = (data0_ref[...][:, :, None]
                   == lax.broadcasted_iota(jnp.int32, (B, S, V), 2)
                   ).astype(jnp.float32)             # (B, S, V) scatter_add matrix
        vocab_iota = lax.broadcasted_iota(jnp.int32, (B, V), 1)

        def softmax_last(x):
            m = jnp.max(x, axis=-1, keepdims=True)
            e = jnp.exp(x - m)
            return e * pl.reciprocal(jnp.sum(e, axis=-1, keepdims=True), approx=True)

        @pl.loop(0, T)
        def _(t):
            x = inp_scratch[...]                     # (B, H) current decoder input
            h = hid_scratch[...]                     # (B, H) GRU hidden

            # ---------------- GRU cell (PyTorch gate order r, z, n) ----------------
            gi = jnp.dot(x, w_ih_t, preferred_element_type=jnp.float32)   # (B, 3H)
            gh = jnp.dot(h, w_hh_t, preferred_element_type=jnp.float32)   # (B, 3H)
            r = jax.nn.sigmoid(gi[:, 0:H] + b_ih[0:1] + gh[:, 0:H] + b_hh[0:1])
            z = jax.nn.sigmoid(gi[:, H:2 * H] + b_ih[1:2] + gh[:, H:2 * H] + b_hh[1:2])
            n = jnp.tanh(gi[:, 2 * H:3 * H] + b_ih[2:3]
                         + r * (gh[:, 2 * H:3 * H] + b_hh[2:3]))
            h_new = (1.0 - z) * n + z * h            # (B, H)

            # lane-dense full-tile store: (1, B, H) slab at step t
            hid_out_ref[0, pl.ds(t, 1), :, :] = h_new[None]

            # ---------------- vocab distribution p_vocab ----------------
            p_vocab_logits = jnp.dot(h_new, emb_t,
                                     preferred_element_type=jnp.float32) + vmask
            p_vocab = softmax_last(p_vocab_logits)                        # (B, V)

            # ---------------- dot attention over encoder outputs (MXU) ----------------
            scores = jnp.einsum('bqh,bsh->bqs', h_new[:, None, :], enc0,
                                preferred_element_type=jnp.float32)[:, 0, :] + mask_add
            prob = softmax_last(scores)                                   # (B, S)
            context = jnp.einsum('bqs,bsh->bqh', prob[:, None, :], enc0,
                                 preferred_element_type=jnp.float32)[:, 0, :]  # (B, H)

            # ---------------- pointer/generator gate: sigmoid(W [h; ctx; x] + b) ----
            gate_pre = (jnp.sum(h_new * wg[0:1], axis=1, keepdims=True)
                        + jnp.sum(context * wg[1:2], axis=1, keepdims=True)
                        + jnp.sum(x * wg[2:3], axis=1, keepdims=True)) + bg
            gate = jax.nn.sigmoid(gate_pre)                               # (B, 1)

            # ---------------- scatter_add(prob -> vocab slots data0) via MXU ----
            p_ctx = jnp.einsum('bqs,bsv->bqv', prob[:, None, :], one_hot,
                               preferred_element_type=jnp.float32)[:, 0, :]   # (B, V)

            final_p = (1.0 - gate) * p_ctx + gate * p_vocab               # (B, V)
            all_out_ref[0, pl.ds(t, 1), :, :] = final_p[None]

            # ---------------- greedy next input (eval path) ----------------
            pred = jnp.argmax(final_p, axis=1)                            # (B,)
            pred_oh = (pred[:, None] == vocab_iota).astype(jnp.float32)   # (B, V)
            new_x = jnp.dot(pred_oh, emb, preferred_element_type=jnp.float32)  # (B, H)

            hid_scratch[...] = h_new
            inp_scratch[...] = new_x

    return kernel


def decoder_forward(dec_init, enc_hid, enc0, mask, data0, params, T):
    """dec_init: (B, num_update, H) like enc_outputs[3]; returns
       (all_point_outputs (B, num_update, T, V), hidden_state (B, num_update, T, H))."""
    B, num_update, H = dec_init.shape
    S = enc0.shape[1]
    V = params["emb"].shape[0]
    f32 = jnp.float32

    # ---- pad to TPU-friendly shapes: B->8 sublanes, S->8, H/V->128 lanes ----
    Bp = _round_up(B, 8)
    Sp = _round_up(S, 8)
    Hp = _round_up(H, 128)
    Vp = _round_up(V, 128)

    def pad2(x, r, c):
        return jnp.pad(x, ((0, r - x.shape[0]), (0, c - x.shape[1])))

    # GRU weights: per-gate zero-pad then pre-transpose to (Hp, 3*Hp)
    def pad_gru_w(w):                      # (3H, H) -> (Hp, 3Hp)
        wp = jnp.zeros((3 * Hp, Hp), f32)
        for g in range(3):
            wp = wp.at[g * Hp:g * Hp + H, :H].set(w[g * H:(g + 1) * H, :])
        return wp.T

    w_ih_t = pad_gru_w(params["w_ih"].astype(f32))
    w_hh_t = pad_gru_w(params["w_hh"].astype(f32))
    b_ih = pad2(params["b_ih"].astype(f32), 3, Hp)
    b_hh = pad2(params["b_hh"].astype(f32), 3, Hp)
    wg = pad2(params["wg"].astype(f32), 3, Hp)
    bg = params["bg"].astype(f32).reshape(1, 1)

    emb = pad2(params["emb"].astype(f32), Vp, Hp)                      # (Vp, Hp)
    emb_t = emb.T                                                      # (Hp, Vp)
    # additive mask that zeroes softmax mass on padded vocab rows
    vocab_mask = jnp.where(jnp.arange(Vp) < V, 0.0, -1e30).astype(f32)[None, :]

    dec_init_u = jnp.transpose(dec_init.astype(f32), (1, 0, 2))        # (nu, B, H)
    dec_init_u = jnp.pad(dec_init_u, ((0, 0), (0, Bp - B), (0, Hp - H)))
    enc_hid_p = pad2(enc_hid.astype(f32), Bp, Hp)
    enc0_p = jnp.pad(enc0.astype(f32), ((0, Bp - B), (0, Sp - S), (0, Hp - H)))
    mask_p = jnp.pad(mask.astype(f32), ((0, Bp - B), (0, Sp - S)))     # padded -> masked
    mask_add = (mask_p - 1.0) * math.pow(2, 32)                        # matches reference
    data0_p = jnp.pad(data0.astype(jnp.int32), ((0, Bp - B), (0, Sp - S)))

    kernel = make_decoder_kernel(Bp, Sp, Hp, Vp, T)

    grid_spec = pltpu.PrefetchScalarGridSpec(
        num_scalar_prefetch=0,
        grid=(num_update,),
        in_specs=[
            pl.BlockSpec((1, Bp, Hp), lambda u: (u, 0, 0)),      # dec_init (per update)
            pl.BlockSpec((Bp, Hp), lambda u: (0, 0)),            # enc hidden
            pl.BlockSpec((Bp, Sp, Hp), lambda u: (0, 0, 0)),     # enc outputs
            pl.BlockSpec((Bp, Sp), lambda u: (0, 0)),            # additive attn mask
            pl.BlockSpec((Bp, Sp), lambda u: (0, 0)),            # pointer ids (int32)
            pl.BlockSpec((1, Vp), lambda u: (0, 0)),             # vocab-pad mask
            pl.BlockSpec((Vp, Hp), lambda u: (0, 0)),            # embedding weight
            pl.BlockSpec((Hp, Vp), lambda u: (0, 0)),            # embedding weight^T
            pl.BlockSpec((Hp, 3 * Hp), lambda u: (0, 0)),        # GRU W_ih^T
            pl.BlockSpec((Hp, 3 * Hp), lambda u: (0, 0)),        # GRU W_hh^T
            pl.BlockSpec((3, Hp), lambda u: (0, 0)),             # GRU b_ih
            pl.BlockSpec((3, Hp), lambda u: (0, 0)),             # GRU b_hh
            pl.BlockSpec((3, Hp), lambda u: (0, 0)),             # gate weight (split)
            pl.BlockSpec((1, 1), lambda u: (0, 0)),              # gate bias
        ],
        out_specs=[
            # lane-dense layout: per-timestep store is a full (Bp, Vp)/(Bp, Hp) tile
            pl.BlockSpec((1, T, Bp, Vp), lambda u: (u, 0, 0, 0)),
            pl.BlockSpec((1, T, Bp, Hp), lambda u: (u, 0, 0, 0)),
        ],
        scratch_shapes=[
            pltpu.VMEM((Bp, Hp), jnp.float32),   # hidden state carry
            pltpu.VMEM((Bp, Hp), jnp.float32),   # decoder input carry
        ],
    )

    all_out, hid_out = pl.pallas_call(
        kernel,
        out_shape=(
            jax.ShapeDtypeStruct((num_update, T, Bp, Vp), jnp.float32),
            jax.ShapeDtypeStruct((num_update, T, Bp, Hp), jnp.float32),
        ),
        grid_spec=grid_spec,
        compiler_params=pltpu.CompilerParams(
            # per-update work is fully independent -> allow megacore sharding (v7x)
            dimension_semantics=("parallel",)),
    )(dec_init_u, enc_hid_p, enc0_p, mask_add, data0_p, vocab_mask,
      emb, emb_t, w_ih_t, w_hh_t, b_ih, b_hh, wg, bg)

    # (nu, T, Bp, Vp) -> PyTorch layout (B, num_update, T, V); strip padding
    all_point_outputs = jnp.transpose(all_out, (2, 0, 1, 3))[:B, :, :, :V]
    hidden_state = jnp.transpose(hid_out, (2, 0, 1, 3))[:B, :, :, :H]
    return all_point_outputs, hidden_state


if __name__ == "__main__":
    # Small, deterministic config
    B, S, H, V = 2, 8, 32, 64         # batch, enc seq len, hidden_size, vocab_size
    num_update, T = 3, 4              # slot updates, max value length
    pad_idx = 0

    key = jax.random.PRNGKey(0)
    keys = jax.random.split(key, 12)

    # Parameters (deterministic synthetic init; shapes follow the nn.Module)
    emb = jax.random.normal(keys[0], (V, H), jnp.float32) * 0.1
    emb = emb.at[pad_idx].set(0.0)                                    # padding_idx row
    params = {
        "emb": emb,
        "w_ih": jax.random.normal(keys[1], (3 * H, H), jnp.float32) * 0.1,  # gates [r,z,n]
        "w_hh": jax.random.normal(keys[2], (3 * H, H), jnp.float32) * 0.1,
        "b_ih": jax.random.normal(keys[3], (3, H), jnp.float32) * 0.01,
        "b_hh": jax.random.normal(keys[4], (3, H), jnp.float32) * 0.01,
        # generation_gate_w: Linear(3H -> 1); weight (1,3H) reshaped to (3,H)
        # rows multiply [hidden, context, decoder_input] respectively.
        "wg": jax.random.normal(keys[5], (3, H), jnp.float32) * 0.1,
        "bg": jnp.zeros((1, 1), jnp.float32),
    }

    # Inputs mirroring the PyTorch forward:
    #   data[0]        -> pointer vocab ids of the dialogue context (B, S)
    #   data[2]        -> context attention mask (B, S) of 0/1
    #   enc_outputs[0] -> encoder outputs (B, S, H)
    #   enc_outputs[1] -> encoder final hidden (B, H)
    #   enc_outputs[3] -> per-slot decoder init embeddings (B, num_update, H)
    data0 = jax.random.randint(keys[6], (B, S), 0, V, jnp.int32)
    mask = jnp.ones((B, S), jnp.float32).at[:, S - 2:].set(0.0)       # mask last 2 tokens
    enc0 = jax.random.normal(keys[7], (B, S, H), jnp.float32)
    enc_hid = jax.random.normal(keys[8], (B, H), jnp.float32)
    dec_init = jax.random.normal(keys[9], (B, num_update, H), jnp.float32)

    all_point_outputs, hidden_state = decoder_forward(
        dec_init, enc_hid, enc0, mask, data0, params, T)
    jax.block_until_ready((all_point_outputs, hidden_state))

    assert all_point_outputs.shape == (B, num_update, T, V)
    assert hidden_state.shape == (B, num_update, T, H)
    assert bool(jnp.all(jnp.isfinite(all_point_outputs)))
    assert bool(jnp.all(jnp.isfinite(hidden_state)))
    print("KERNEL_OK")
</pallas_src>

<mosaic_0001>
module attributes {stable_mosaic.version = 11 : i64} {
  func.func @kernel(%arg0: i32, %arg1: memref<1x8x128xf32, #tpu.memory_space<vmem>>, %arg2: memref<8x128xf32, #tpu.memory_space<vmem>>, %arg3: memref<8x8x128xf32, #tpu.memory_space<vmem>>, %arg4: memref<8x8xf32, #tpu.memory_space<vmem>>, %arg5: memref<8x8xi32, #tpu.memory_space<vmem>>, %arg6: memref<1x128xf32, #tpu.memory_space<vmem>>, %arg7: memref<128x128xf32, #tpu.memory_space<vmem>>, %arg8: memref<128x128xf32, #tpu.memory_space<vmem>>, %arg9: memref<128x384xf32, #tpu.memory_space<vmem>>, %arg10: memref<128x384xf32, #tpu.memory_space<vmem>>, %arg11: memref<3x128xf32, #tpu.memory_space<vmem>>, %arg12: memref<3x128xf32, #tpu.memory_space<vmem>>, %arg13: memref<3x128xf32, #tpu.memory_space<vmem>>, %arg14: memref<1x1xf32, #tpu.memory_space<vmem>>, %arg15: memref<1x4x8x128xf32, #tpu.memory_space<vmem>>, %arg16: memref<1x4x8x128xf32, #tpu.memory_space<vmem>>, %arg17: memref<8x128xf32, #tpu.memory_space<vmem>>, %arg18: memref<8x128xf32, #tpu.memory_space<vmem>>) attributes {dimension_semantics = [#tpu.dimension_semantics<parallel>], iteration_bounds = array<i64: 3>, scalar_prefetch = 0 : i64, scratch_operands = 2 : i64, tpu.core_type = #tpu.core_type<tc>, window_params = [{transform_indices = @transform_0, window_bounds = array<i64: 1, 8, 128>}, {pipeline_mode = #tpu.pipeline_mode<synchronous>, transform_indices = @transform_1, window_bounds = array<i64: 8, 128>}, {pipeline_mode = #tpu.pipeline_mode<synchronous>, transform_indices = @transform_2, window_bounds = array<i64: 8, 8, 128>}, {pipeline_mode = #tpu.pipeline_mode<synchronous>, transform_indices = @transform_3, window_bounds = array<i64: 8, 8>}, {pipeline_mode = #tpu.pipeline_mode<synchronous>, transform_indices = @transform_4, window_bounds = array<i64: 8, 8>}, {pipeline_mode = #tpu.pipeline_mode<synchronous>, transform_indices = @transform_5, window_bounds = array<i64: 1, 128>}, {pipeline_mode = #tpu.pipeline_mode<synchronous>, transform_indices = @transform_6, window_bounds = array<i64: 128, 128>}, {pipeline_mode = #tpu.pipeline_mode<synchronous>, transform_indices = @transform_7, window_bounds = array<i64: 128, 128>}, {pipeline_mode = #tpu.pipeline_mode<synchronous>, transform_indices = @transform_8, window_bounds = array<i64: 128, 384>}, {pipeline_mode = #tpu.pipeline_mode<synchronous>, transform_indices = @transform_9, window_bounds = array<i64: 128, 384>}, {pipeline_mode = #tpu.pipeline_mode<synchronous>, transform_indices = @transform_10, window_bounds = array<i64: 3, 128>}, {pipeline_mode = #tpu.pipeline_mode<synchronous>, transform_indices = @transform_11, window_bounds = array<i64: 3, 128>}, {pipeline_mode = #tpu.pipeline_mode<synchronous>, transform_indices = @transform_12, window_bounds = array<i64: 3, 128>}, {pipeline_mode = #tpu.pipeline_mode<synchronous>, transform_indices = @transform_13, window_bounds = array<i64: 1, 1>}, {transform_indices = @transform_14, window_bounds = array<i64: 1, 4, 8, 128>}, {transform_indices = @transform_15, window_bounds = array<i64: 1, 4, 8, 128>}]} {
    %c0 = arith.constant 0 : index
    %c0_0 = arith.constant 0 : index
    %0 = vector.load %arg2[%c0, %c0_0] : memref<8x128xf32, #tpu.memory_space<vmem>>, vector<8x128xf32>
    %c0_1 = arith.constant 0 : index
    %c0_2 = arith.constant 0 : index
    %1 = vector.load %arg17[%c0_1, %c0_2] : memref<8x128xf32, #tpu.memory_space<vmem>>, vector<8x128xf32>
    tpu.vector_store %arg17[%c0_1, %c0_2], %0 {strides = array<i32>} : memref<8x128xf32, #tpu.memory_space<vmem>>, vector<8x128xf32>,
    %c0_3 = arith.constant 0 : index
    %c0_4 = arith.constant 0 : index
    %c0_5 = arith.constant 0 : index
    %2 = vector.load %arg1[%c0_3, %c0_4, %c0_5] : memref<1x8x128xf32, #tpu.memory_space<vmem>>, vector<1x8x128xf32>
    %3 = vector.shape_cast %2 : vector<1x8x128xf32> to vector<8x128xf32>
    %c0_6 = arith.constant 0 : index
    %c0_7 = arith.constant 0 : index
    %4 = vector.load %arg18[%c0_6, %c0_7] : memref<8x128xf32, #tpu.memory_space<vmem>>, vector<8x128xf32>
    tpu.vector_store %arg18[%c0_6, %c0_7], %3 {strides = array<i32>} : memref<8x128xf32, #tpu.memory_space<vmem>>, vector<8x128xf32>,
    %c0_8 = arith.constant 0 : index
    %c0_9 = arith.constant 0 : index
    %c0_10 = arith.constant 0 : index
    %5 = vector.load %arg3[%c0_8, %c0_9, %c0_10] : memref<8x8x128xf32, #tpu.memory_space<vmem>>, vector<8x8x128xf32>
    %c0_11 = arith.constant 0 : index
    %c0_12 = arith.constant 0 : index
    %6 = vector.load %arg4[%c0_11, %c0_12] : memref<8x8xf32, #tpu.memory_space<vmem>>, vector<8x8xf32>
    %c0_13 = arith.constant 0 : index
    %c0_14 = arith.constant 0 : index
    %7 = vector.load %arg6[%c0_13, %c0_14] : memref<1x128xf32, #tpu.memory_space<vmem>>, vector<1x128xf32>
    %c0_15 = arith.constant 0 : index
    %c0_16 = arith.constant 0 : index
    %8 = vector.load %arg7[%c0_15, %c0_16] : memref<128x128xf32, #tpu.memory_space<vmem>>, vector<128x128xf32>
    %c0_17 = arith.constant 0 : index
    %c0_18 = arith.constant 0 : index
    %9 = vector.load %arg8[%c0_17, %c0_18] : memref<128x128xf32, #tpu.memory_space<vmem>>, vector<128x128xf32>
    %c0_19 = arith.constant 0 : index
    %c0_20 = arith.constant 0 : index
    %10 = vector.load %arg9[%c0_19, %c0_20] : memref<128x384xf32, #tpu.memory_space<vmem>>, vector<128x384xf32>
    %c0_21 = arith.constant 0 : index
    %c0_22 = arith.constant 0 : index
    %11 = vector.load %arg10[%c0_21, %c0_22] : memref<128x384xf32, #tpu.memory_space<vmem>>, vector<128x384xf32>
    %c0_23 = arith.constant 0 : index
    %c0_24 = arith.constant 0 : index
    %12 = vector.load %arg11[%c0_23, %c0_24] : memref<3x128xf32, #tpu.memory_space<vmem>>, vector<3x128xf32>
    %c0_25 = arith.constant 0 : index
    %c0_26 = arith.constant 0 : index
    %13 = vector.load %arg12[%c0_25, %c0_26] : memref<3x128xf32, #tpu.memory_space<vmem>>, vector<3x128xf32>
    %c0_27 = arith.constant 0 : index
    %c0_28 = arith.constant 0 : index
    %14 = vector.load %arg13[%c0_27, %c0_28] : memref<3x128xf32, #tpu.memory_space<vmem>>, vector<3x128xf32>
    %c0_29 = arith.constant 0 : index
    %c0_30 = arith.constant 0 : index
    %15 = vector.load %arg14[%c0_29, %c0_30] : memref<1x1xf32, #tpu.memory_space<vmem>>, vector<1x1xf32>
    %c0_31 = arith.constant 0 : index
    %c0_32 = arith.constant 0 : index
    %16 = vector.load %arg5[%c0_31, %c0_32] : memref<8x8xi32, #tpu.memory_space<vmem>>, vector<8x8xi32>
    %17 = vector.shape_cast %16 : vector<8x8xi32> to vector<8x8x1xi32>
    %18 = tpu.iota {dimensions = array<i32: 2>} : vector<8x8x128xi32>
    %19 = vector.broadcast %17 : vector<8x8x1xi32> to vector<8x8x128xi32>
    %20 = arith.cmpi eq, %19, %18 : vector<8x8x128xi32>
    %21 = arith.extui %20 : vector<8x8x128xi1> to vector<8x8x128xi32>
    %22 = arith.sitofp %21 : vector<8x8x128xi32> to vector<8x8x128xf32>
    %23 = tpu.iota {dimensions = array<i32: 1>} : vector<8x128xi32>
    %c0_i32 = arith.constant 0 : i32
    %c4_i32 = arith.constant 4 : i32
    %24 = arith.addi %c0_i32, %c4_i32 : i32
    %c1_i32 = arith.constant 1 : i32
    scf.for %arg19 = %c0_i32 to %24 step %c1_i32  : i32 {
      %c1_i32_34 = arith.constant 1 : i32
      %25 = arith.muli %arg19, %c1_i32_34 : i32
      %c0_i32_35 = arith.constant 0 : i32
      %26 = arith.addi %c0_i32_35, %25 : i32
      %c0_36 = arith.constant 0 : index
      %c0_37 = arith.constant 0 : index
      %27 = vector.load %arg18[%c0_36, %c0_37] : memref<8x128xf32, #tpu.memory_space<vmem>>, vector<8x128xf32>
      %c0_38 = arith.constant 0 : index
      %c0_39 = arith.constant 0 : index
      %28 = vector.load %arg17[%c0_38, %c0_39] : memref<8x128xf32, #tpu.memory_space<vmem>>, vector<8x128xf32>
      %cst = arith.constant dense<0.000000e+00> : vector<8x384xf32>
      %29 = tpu.matmul %27, %10, %cst {dimension_numbers = #tpu.dot_dimension_numbers<[1], [0], [0], [1], [0, 0, 1, 1], [], []>} : vector<8x128xf32>, vector<128x384xf32>, vector<8x384xf32> -> vector<8x384xf32>
      %cst_40 = arith.constant dense<0.000000e+00> : vector<8x384xf32>
      %30 = tpu.matmul %28, %11, %cst_40 {dimension_numbers = #tpu.dot_dimension_numbers<[1], [0], [0], [1], [0, 0, 1, 1], [], []>} : vector<8x128xf32>, vector<128x384xf32>, vector<8x384xf32> -> vector<8x384xf32>
      %31 = vector.extract_strided_slice %29 {offsets = [0, 0], sizes = [8, 128], strides = [1, 1]} : vector<8x384xf32> to vector<8x128xf32>
      %32 = vector.extract_strided_slice %12 {offsets = [0, 0], sizes = [1, 128], strides = [1, 1]} : vector<3x128xf32> to vector<1x128xf32>
      %33 = vector.broadcast %32 : vector<1x128xf32> to vector<8x128xf32>
      %34 = arith.addf %31, %33 : vector<8x128xf32>
      %35 = vector.extract_strided_slice %30 {offsets = [0, 0], sizes = [8, 128], strides = [1, 1]} : vector<8x384xf32> to vector<8x128xf32>
      %36 = arith.addf %34, %35 : vector<8x128xf32>
      %37 = vector.extract_strided_slice %13 {offsets = [0, 0], sizes = [1, 128], strides = [1, 1]} : vector<3x128xf32> to vector<1x128xf32>
      %38 = vector.broadcast %37 : vector<1x128xf32> to vector<8x128xf32>
      %39 = arith.addf %36, %38 : vector<8x128xf32>
      %40 = arith.negf %39 : vector<8x128xf32>
      %41 = math.exp %40 : vector<8x128xf32>
      %cst_41 = arith.constant 1.000000e+00 : f32
      %42 = vector.broadcast %cst_41 : f32 to vector<8x128xf32>
      %43 = arith.addf %42, %41 : vector<8x128xf32>
      %44 = arith.divf %42, %43 : vector<8x128xf32>
      %45 = vector.extract_strided_slice %29 {offsets = [0, 128], sizes = [8, 128], strides = [1, 1]} : vector<8x384xf32> to vector<8x128xf32>
      %46 = vector.extract_strided_slice %12 {offsets = [1, 0], sizes = [1, 128], strides = [1, 1]} : vector<3x128xf32> to vector<1x128xf32>
      %47 = vector.broadcast %46 : vector<1x128xf32> to vector<8x128xf32>
      %48 = arith.addf %45, %47 : vector<8x128xf32>
      %49 = vector.extract_strided_slice %30 {offsets = [0, 128], sizes = [8, 128], strides = [1, 1]} : vector<8x384xf32> to vector<8x128xf32>
      %50 = arith.addf %48, %49 : vector<8x128xf32>
      %51 = vector.extract_strided_slice %13 {offsets = [1, 0], sizes = [1, 128], strides = [1, 1]} : vector<3x128xf32> to vector<1x128xf32>
      %52 = vector.broadcast %51 : vector<1x128xf32> to vector<8x128xf32>
      %53 = arith.addf %50, %52 : vector<8x128xf32>
      %54 = arith.negf %53 : vector<8x128xf32>
      %55 = math.exp %54 : vector<8x128xf32>
      %cst_42 = arith.constant 1.000000e+00 : f32
      %56 = vector.broadcast %cst_42 : f32 to vector<8x128xf32>
      %57 = arith.addf %56, %55 : vector<8x128xf32>
      %58 = arith.divf %56, %57 : vector<8x128xf32>
      %59 = vector.extract_strided_slice %29 {offsets = [0, 256], sizes = [8, 128], strides = [1, 1]} : vector<8x384xf32> to vector<8x128xf32>
      %60 = vector.extract_strided_slice %12 {offsets = [2, 0], sizes = [1, 128], strides = [1, 1]} : vector<3x128xf32> to vector<1x128xf32>
      %61 = vector.broadcast %60 : vector<1x128xf32> to vector<8x128xf32>
      %62 = arith.addf %59, %61 : vector<8x128xf32>
      %63 = vector.extract_strided_slice %30 {offsets = [0, 256], sizes = [8, 128], strides = [1, 1]} : vector<8x384xf32> to vector<8x128xf32>
      %64 = vector.extract_strided_slice %13 {offsets = [2, 0], sizes = [1, 128], strides = [1, 1]} : vector<3x128xf32> to vector<1x128xf32>
      %65 = vector.broadcast %64 : vector<1x128xf32> to vector<8x128xf32>
      %66 = arith.addf %63, %65 : vector<8x128xf32>
      %67 = arith.mulf %44, %66 : vector<8x128xf32>
      %68 = arith.addf %62, %67 : vector<8x128xf32>
      %69 = math.tanh %68 : vector<8x128xf32>
      %cst_43 = arith.constant 1.000000e+00 : f32
      %70 = vector.broadcast %cst_43 : f32 to vector<8x128xf32>
      %71 = arith.subf %70, %58 : vector<8x128xf32>
      %72 = arith.mulf %71, %69 : vector<8x128xf32>
      %73 = arith.mulf %58, %28 : vector<8x128xf32>
      %74 = arith.addf %72, %73 : vector<8x128xf32>
      %75 = vector.shape_cast %74 : vector<8x128xf32> to vector<1x8x128xf32>
      %c0_44 = arith.constant 0 : index
      %76 = arith.index_cast %26 : i32 to index
      %c0_45 = arith.constant 0 : index
      %c0_46 = arith.constant 0 : index
      %77 = vector.load %arg16[%c0_44, %76, %c0_45, %c0_46] : memref<1x4x8x128xf32, #tpu.memory_space<vmem>>, vector<1x1x8x128xf32>
      %78 = vector.shape_cast %77 : vector<1x1x8x128xf32> to vector<1x8x128xf32>
      %79 = vector.shape_cast %75 : vector<1x8x128xf32> to vector<1x1x8x128xf32>
      tpu.vector_store %arg16[%c0_44, %76, %c0_45, %c0_46], %79 {strides = array<i32>} : memref<1x4x8x128xf32, #tpu.memory_space<vmem>>, vector<1x1x8x128xf32>,
      %cst_47 = arith.constant dense<0.000000e+00> : vector<8x128xf32>
      %80 = tpu.matmul %74, %9, %cst_47 {dimension_numbers = #tpu.dot_dimension_numbers<[1], [0], [0], [1], [0, 0, 1, 1], [], []>} : vector<8x128xf32>, vector<128x128xf32>, vector<8x128xf32> -> vector<8x128xf32>
      %81 = vector.broadcast %7 : vector<1x128xf32> to vector<8x128xf32>
      %82 = arith.addf %80, %81 : vector<8x128xf32>
      %cst_48 = arith.constant dense<0xFF800000> : vector<8xf32>
      %83 = vector.multi_reduction <maximumf>, %82, %cst_48 [1] : vector<8x128xf32> to vector<8xf32>
      %84 = vector.shape_cast %83 : vector<8xf32> to vector<8x1xf32>
      %85 = vector.broadcast %84 : vector<8x1xf32> to vector<8x128xf32>
      %86 = arith.subf %82, %85 : vector<8x128xf32>
      %87 = math.exp %86 : vector<8x128xf32>
      %cst_49 = arith.constant dense<0.000000e+00> : vector<8xf32>
      %88 = vector.multi_reduction <add>, %87, %cst_49 [1] : vector<8x128xf32> to vector<8xf32>
      %89 = vector.shape_cast %88 : vector<8xf32> to vector<8x1xf32>
      %90 = tpu.reciprocal %89 {approx = true} : vector<8x1xf32> -> vector<8x1xf32>
      %91 = vector.broadcast %90 : vector<8x1xf32> to vector<8x128xf32>
      %92 = arith.mulf %87, %91 : vector<8x128xf32>
      %93 = vector.shape_cast %74 : vector<8x128xf32> to vector<8x1x128xf32>
      "tpu.trace_start"() <{level = 10 : i32, message = "bqh,bsh->bqs"}> : () -> ()
      %cst_50 = arith.constant dense<0.000000e+00> : vector<8x1x8xf32>
      %94 = tpu.matmul %93, %5, %cst_50 {dimension_numbers = #tpu.dot_dimension_numbers<[2], [2], [1], [1], [0, 0, 0, 1, 1, 1], [0], [0]>} : vector<8x1x128xf32>, vector<8x8x128xf32>, vector<8x1x8xf32> -> vector<8x1x8xf32>
      "tpu.trace_stop"() : () -> ()
      %95 = vector.shape_cast %94 : vector<8x1x8xf32> to vector<8x8xf32>
      %96 = arith.addf %95, %6 : vector<8x8xf32>
      %cst_51 = arith.constant dense<0xFF800000> : vector<8xf32>
      %97 = vector.multi_reduction <maximumf>, %96, %cst_51 [1] : vector<8x8xf32> to vector<8xf32>
      %98 = vector.shape_cast %97 : vector<8xf32> to vector<8x1xf32>
      %99 = vector.broadcast %98 : vector<8x1xf32> to vector<8x8xf32>
      %100 = arith.subf %96, %99 : vector<8x8xf32>
      %101 = math.exp %100 : vector<8x8xf32>
      %cst_52 = arith.constant dense<0.000000e+00> : vector<8xf32>
      %102 = vector.multi_reduction <add>, %101, %cst_52 [1] : vector<8x8xf32> to vector<8xf32>
      %103 = vector.shape_cast %102 : vector<8xf32> to vector<8x1xf32>
      %104 = tpu.reciprocal %103 {approx = true} : vector<8x1xf32> -> vector<8x1xf32>
      %105 = vector.broadcast %104 : vector<8x1xf32> to vector<8x8xf32>
      %106 = arith.mulf %101, %105 : vector<8x8xf32>
      %107 = vector.shape_cast %106 : vector<8x8xf32> to vector<8x1x8xf32>
      "tpu.trace_start"() <{level = 10 : i32, message = "bqs,bsh->bqh"}> : () -> ()
      %cst_53 = arith.constant dense<0.000000e+00> : vector<8x1x128xf32>
      %108 = tpu.matmul %107, %5, %cst_53 {dimension_numbers = #tpu.dot_dimension_numbers<[2], [1], [1], [2], [0, 0, 0, 1, 1, 2], [0], [0]>} : vector<8x1x8xf32>, vector<8x8x128xf32>, vector<8x1x128xf32> -> vector<8x1x128xf32>
      "tpu.trace_stop"() : () -> ()
      %109 = vector.shape_cast %108 : vector<8x1x128xf32> to vector<8x128xf32>
      %110 = vector.extract_strided_slice %14 {offsets = [0, 0], sizes = [1, 128], strides = [1, 1]} : vector<3x128xf32> to vector<1x128xf32>
      %111 = vector.broadcast %110 : vector<1x128xf32> to vector<8x128xf32>
      %112 = arith.mulf %74, %111 : vector<8x128xf32>
      %cst_54 = arith.constant dense<0.000000e+00> : vector<8xf32>
      %113 = vector.multi_reduction <add>, %112, %cst_54 [1] : vector<8x128xf32> to vector<8xf32>
      %114 = vector.shape_cast %113 : vector<8xf32> to vector<8x1xf32>
      %115 = vector.extract_strided_slice %14 {offsets = [1, 0], sizes = [1, 128], strides = [1, 1]} : vector<3x128xf32> to vector<1x128xf32>
      %116 = vector.broadcast %115 : vector<1x128xf32> to vector<8x128xf32>
      %117 = arith.mulf %109, %116 : vector<8x128xf32>
      %cst_55 = arith.constant dense<0.000000e+00> : vector<8xf32>
      %118 = vector.multi_reduction <add>, %117, %cst_55 [1] : vector<8x128xf32> to vector<8xf32>
      %119 = vector.shape_cast %118 : vector<8xf32> to vector<8x1xf32>
      %120 = arith.addf %114, %119 : vector<8x1xf32>
      %121 = vector.extract_strided_slice %14 {offsets = [2, 0], sizes = [1, 128], strides = [1, 1]} : vector<3x128xf32> to vector<1x128xf32>
      %122 = vector.broadcast %121 : vector<1x128xf32> to vector<8x128xf32>
      %123 = arith.mulf %27, %122 : vector<8x128xf32>
      %cst_56 = arith.constant dense<0.000000e+00> : vector<8xf32>
      %124 = vector.multi_reduction <add>, %123, %cst_56 [1] : vector<8x128xf32> to vector<8xf32>
      %125 = vector.shape_cast %124 : vector<8xf32> to vector<8x1xf32>
      %126 = arith.addf %120, %125 : vector<8x1xf32>
      %127 = vector.broadcast %15 : vector<1x1xf32> to vector<8x1xf32>
      %128 = arith.addf %126, %127 : vector<8x1xf32>
      %129 = arith.negf %128 : vector<8x1xf32>
      %130 = math.exp %129 : vector<8x1xf32>
      %cst_57 = arith.constant 1.000000e+00 : f32
      %131 = vector.broadcast %cst_57 : f32 to vector<8x1xf32>
      %132 = arith.addf %131, %130 : vector<8x1xf32>
      %133 = arith.divf %131, %132 : vector<8x1xf32>
      %134 = vector.shape_cast %106 : vector<8x8xf32> to vector<8x1x8xf32>
      "tpu.trace_start"() <{level = 10 : i32, message = "bqs,bsv->bqv"}> : () -> ()
      %cst_58 = arith.constant dense<0.000000e+00> : vector<8x1x128xf32>
      %135 = tpu.matmul %134, %22, %cst_58 {dimension_numbers = #tpu.dot_dimension_numbers<[2], [1], [1], [2], [0, 0, 0, 1, 1, 2], [0], [0]>} : vector<8x1x8xf32>, vector<8x8x128xf32>, vector<8x1x128xf32> -> vector<8x1x128xf32>
      "tpu.trace_stop"() : () -> ()
      %136 = vector.shape_cast %135 : vector<8x1x128xf32> to vector<8x128xf32>
      %cst_59 = arith.constant 1.000000e+00 : f32
      %137 = vector.broadcast %cst_59 : f32 to vector<8x1xf32>
      %138 = arith.subf %137, %133 : vector<8x1xf32>
      %139 = vector.broadcast %138 : vector<8x1xf32> to vector<8x128xf32>
      %140 = arith.mulf %139, %136 : vector<8x128xf32>
      %141 = vector.broadcast %133 : vector<8x1xf32> to vector<8x128xf32>
      %142 = arith.mulf %141, %92 : vector<8x128xf32>
      %143 = arith.addf %140, %142 : vector<8x128xf32>
      %144 = vector.shape_cast %143 : vector<8x128xf32> to vector<1x8x128xf32>
      %c0_60 = arith.constant 0 : index
      %145 = arith.index_cast %26 : i32 to index
      %c0_61 = arith.constant 0 : index
      %c0_62 = arith.constant 0 : index
      %146 = vector.load %arg15[%c0_60, %145, %c0_61, %c0_62] : memref<1x4x8x128xf32, #tpu.memory_space<vmem>>, vector<1x1x8x128xf32>
      %147 = vector.shape_cast %146 : vector<1x1x8x128xf32> to vector<1x8x128xf32>
      %148 = vector.shape_cast %144 : vector<1x8x128xf32> to vector<1x1x8x128xf32>
      tpu.vector_store %arg15[%c0_60, %145, %c0_61, %c0_62], %148 {strides = array<i32>} : memref<1x4x8x128xf32, #tpu.memory_space<vmem>>, vector<1x1x8x128xf32>,
      %149 = tpu.reduce_index %143 {axis = 1 : i32, kind = #tpu.reduction_kind<arg_max>} : vector<8x128xf32> -> vector<8xi32>
      %150 = vector.shape_cast %149 : vector<8xi32> to vector<8x1xi32>
      %151 = vector.broadcast %150 : vector<8x1xi32> to vector<8x128xi32>
      %152 = arith.cmpi eq, %151, %23 : vector<8x128xi32>
      %153 = arith.extui %152 : vector<8x128xi1> to vector<8x128xi32>
      %154 = arith.sitofp %153 : vector<8x128xi32> to vector<8x128xf32>
      %cst_63 = arith.constant dense<0.000000e+00> : vector<8x128xf32>
      %155 = tpu.matmul %154, %8, %cst_63 {dimension_numbers = #tpu.dot_dimension_numbers<[1], [0], [0], [1], [0, 0, 1, 1], [], []>} : vector<8x128xf32>, vector<128x128xf32>, vector<8x128xf32> -> vector<8x128xf32>
      %c0_64 = arith.constant 0 : index
      %c0_65 = arith.constant 0 : index
      %156 = vector.load %arg17[%c0_64, %c0_65] : memref<8x128xf32, #tpu.memory_space<vmem>>, vector<8x128xf32>
      tpu.vector_store %arg17[%c0_64, %c0_65], %74 {strides = array<i32>} : memref<8x128xf32, #tpu.memory_space<vmem>>, vector<8x128xf32>,
      %c0_66 = arith.constant 0 : index
      %c0_67 = arith.constant 0 : index
      %157 = vector.load %arg18[%c0_66, %c0_67] : memref<8x128xf32, #tpu.memory_space<vmem>>, vector<8x128xf32>
      tpu.vector_store %arg18[%c0_66, %c0_67], %155 {strides = array<i32>} : memref<8x128xf32, #tpu.memory_space<vmem>>, vector<8x128xf32>,
    }
    %c4_i32_33 = arith.constant 4 : i32
    return
  }
  func.func @transform_0(%arg0: i32) -> (i32, i32, i32) {
    %c0_i32 = arith.constant 0 : i32
    %c0_i32_0 = arith.constant 0 : i32
    %c0_i32_1 = arith.constant 0 : i32
    return %arg0, %c0_i32, %c0_i32_0 : i32, i32, i32
  }
  func.func @transform_1(%arg0: i32) -> (i32, i32) {
    %c0_i32 = arith.constant 0 : i32
    %c0_i32_0 = arith.constant 0 : i32
    %c0_i32_1 = arith.constant 0 : i32
    return %c0_i32, %c0_i32_0 : i32, i32
  }
  func.func @transform_2(%arg0: i32) -> (i32, i32, i32) {
    %c0_i32 = arith.constant 0 : i32
    %c0_i32_0 = arith.constant 0 : i32
    %c0_i32_1 = arith.constant 0 : i32
    %c0_i32_2 = arith.constant 0 : i32
    return %c0_i32, %c0_i32_0, %c0_i32_1 : i32, i32, i32
  }
  func.func @transform_3(%arg0: i32) -> (i32, i32) {
    %c0_i32 = arith.constant 0 : i32
    %c0_i32_0 = arith.constant 0 : i32
    %c0_i32_1 = arith.constant 0 : i32
    return %c0_i32, %c0_i32_0 : i32, i32
  }
  func.func @transform_4(%arg0: i32) -> (i32, i32) {
    %c0_i32 = arith.constant 0 : i32
    %c0_i32_0 = arith.constant 0 : i32
    %c0_i32_1 = arith.constant 0 : i32
    return %c0_i32, %c0_i32_0 : i32, i32
  }
  func.func @transform_5(%arg0: i32) -> (i32, i32) {
    %c0_i32 = arith.constant 0 : i32
    %c0_i32_0 = arith.constant 0 : i32
    %c0_i32_1 = arith.constant 0 : i32
    return %c0_i32, %c0_i32_0 : i32, i32
  }
  func.func @transform_6(%arg0: i32) -> (i32, i32) {
    %c0_i32 = arith.constant 0 : i32
    %c0_i32_0 = arith.constant 0 : i32
    %c0_i32_1 = arith.constant 0 : i32
    return %c0_i32, %c0_i32_0 : i32, i32
  }
  func.func @transform_7(%arg0: i32) -> (i32, i32) {
    %c0_i32 = arith.constant 0 : i32
    %c0_i32_0 = arith.constant 0 : i32
    %c0_i32_1 = arith.constant 0 : i32
    return %c0_i32, %c0_i32_0 : i32, i32
  }
  func.func @transform_8(%arg0: i32) -> (i32, i32) {
    %c0_i32 = arith.constant 0 : i32
    %c0_i32_0 = arith.constant 0 : i32
    %c0_i32_1 = arith.constant 0 : i32
    return %c0_i32, %c0_i32_0 : i32, i32
  }
  func.func @transform_9(%arg0: i32) -> (i32, i32) {
    %c0_i32 = arith.constant 0 : i32
    %c0_i32_0 = arith.constant 0 : i32
    %c0_i32_1 = arith.constant 0 : i32
    return %c0_i32, %c0_i32_0 : i32, i32
  }
  func.func @transform_10(%arg0: i32) -> (i32, i32) {
    %c0_i32 = arith.constant 0 : i32
    %c0_i32_0 = arith.constant 0 : i32
    %c0_i32_1 = arith.constant 0 : i32
    return %c0_i32, %c0_i32_0 : i32, i32
  }
  func.func @transform_11(%arg0: i32) -> (i32, i32) {
    %c0_i32 = arith.constant 0 : i32
    %c0_i32_0 = arith.constant 0 : i32
    %c0_i32_1 = arith.constant 0 : i32
    return %c0_i32, %c0_i32_0 : i32, i32
  }
  func.func @transform_12(%arg0: i32) -> (i32, i32) {
    %c0_i32 = arith.constant 0 : i32
    %c0_i32_0 = arith.constant 0 : i32
    %c0_i32_1 = arith.constant 0 : i32
    return %c0_i32, %c0_i32_0 : i32, i32
  }
  func.func @transform_13(%arg0: i32) -> (i32, i32) {
    %c0_i32 = arith.constant 0 : i32
    %c0_i32_0 = arith.constant 0 : i32
    %c0_i32_1 = arith.constant 0 : i32
    return %c0_i32, %c0_i32_0 : i32, i32
  }
  func.func @transform_14(%arg0: i32) -> (i32, i32, i32, i32) {
    %c0_i32 = arith.constant 0 : i32
    %c0_i32_0 = arith.constant 0 : i32
    %c0_i32_1 = arith.constant 0 : i32
    %c0_i32_2 = arith.constant 0 : i32
    return %arg0, %c0_i32, %c0_i32_0, %c0_i32_1 : i32, i32, i32, i32
  }
  func.func @transform_15(%arg0: i32) -> (i32, i32, i32, i32) {
    %c0_i32 = arith.constant 0 : i32
    %c0_i32_0 = arith.constant 0 : i32
    %c0_i32_1 = arith.constant 0 : i32
    %c0_i32_2 = arith.constant 0 : i32
    return %arg0, %c0_i32, %c0_i32_0, %c0_i32_1 : i32, i32, i32, i32
  }
}

</mosaic_0001>

<bundles_post_ra>
// kernel: tpu_custom_call.1
= control target key start
LH: loop header
LB: loop body
LE: loop exit
PB: predicated region body
PF: predicated region fallthrough
CT: control target
= control target key end

     0   :  { %s5907_s0 = inlined_call_operand.hbm [shape: f32[3,8,128], index: 0, kind: input, shape index: {}]   ;;  %s5908_s1 = inlined_call_operand.hbm [shape: f32[8,128], index: 1, kind: input, shape index: {}]   ;;  %s5909_s2 = inlined_call_operand.hbm [shape: f32[8,8,128], index: 2, kind: input, shape index: {}]   ;;  %s5910_s3 = inlined_call_operand.vmem [shape: f32[8,8], index: 3, kind: input, shape index: {}]   ;;  %s5911_s4 = inlined_call_operand.vmem [shape: s32[8,8], index: 4, kind: input, shape index: {}]   ;;  %s5912_s5 = inlined_call_operand.vmem [shape: f32[1,128], index: 5, kind: input, shape index: {}]   ;;  %s5913_s6 = inlined_call_operand.hbm [shape: f32[128,128], index: 6, kind: input, shape index: {}]   ;;  %s5914_s7 = inlined_call_operand.hbm [shape: f32[128,128], index: 7, kind: input, shape index: {}]   ;;  %s5915_s8 = inlined_call_operand.hbm [shape: f32[128,384], index: 8, kind: input, shape index: {}]   ;;  %s5916_s9 = inlined_call_operand.hbm [shape: f32[128,384], index: 9, kind: input, shape index: {}]   ;;  %s5917_s10 = inlined_call_operand.vmem [shape: f32[3,128], index: 10, kind: input, shape index: {}]   ;;  %s5918_s11 = inlined_call_operand.vmem [shape: f32[3,128], index: 11, kind: input, shape index: {}]   ;;  %s5919_s12 = inlined_call_operand.vmem [shape: f32[3,128], index: 12, kind: input, shape index: {}]   ;;  %s5920_s13 = inlined_call_operand.<no memory space> [shape: f32[1,1], index: 13, kind: input, shape index: {}]   ;;  %s5921_s14 = inlined_call_operand.hbm [shape: f32[3,4,8,128], index: 14, kind: output, shape index: {0}]   ;;  %s5922_s15 = inlined_call_operand.hbm [shape: f32[3,4,8,128], index: 15, kind: output, shape index: {1}]  }
   0x1   :  { %5960 = sst [smem:[#allocation162_spill]] %s5907_s0  ;;  %v21_v0 = vstv %s5920_s13 }
   0x2   :  { %5961 = sst [smem:[#allocation163_spill]] %s5908_s1  ;;  %22 = vst [vmem:[#allocation4] sm:$0x1] %v21_v0 }
   0x3   :  { %5962 = sst [smem:[#allocation164_spill]] %s5909_s2 }
   0x4   :  { %5963 = sst [smem:[#allocation165_spill]] %s5911_s4 }
   0x5   :  { %5964 = sst [smem:[#allocation166_spill]] %s5913_s6 }
   0x6   :  { %5965 = sst [smem:[#allocation167_spill]] %s5917_s10 }
   0x7   :  { %5966 = sst [smem:[#allocation168_spill]] %s5918_s11 }
   0x8   :  { %5967 = sst [smem:[#allocation169_spill]] %s5919_s12 }
   0x9   :  { %5968 = sst [smem:[#allocation170_spill]] %s5921_s14 }
   0xa   :  { %5969 = sst [smem:[#allocation171_spill]] %s5922_s15 }
   0xb   :  { %23 = vsyncpa [#allocation6], 0 }
   0xc   :  { %25 = vsyncpa [#allocation6 + $0x1], 0 }
   0xd   :  { %26 = vsyncpa [#allocation9], 0 }
   0xe   :  { %27 = vsyncpa [#allocation12], 0 }
   0xf   :  { %28 = vsyncpa [#allocation15], 0 }
  0x10   :  { %29 = vsyncpa [#allocation7], 0 }
  0x11   :  { %31 = vsyncpa [#allocation7 + $0x1], 0 }
  0x12   :  { %32 = vsyncpa [#allocation19], 0 }
  0x13   :  { %34 = vsyncpa [#allocation19 + $0x1], 0  ;;  %s4768_s20 = smov 0   ;;  %s4770_s21 = smov 0  }
  0x14   :  { %s4772_s22 = smov 0   ;;  %s4774_s23 = smov 0  }
  0x15 LB: > { %s4664_s13 = smov [#allocation8]   ;;  %s4789_s25 = sadd.s32 4294967295, %s4658_s23   ;;  %s4658_s23 = sphi %s4774_s23, %s6279_s23   ;;  %s4654_s22 = sphi %s4772_s22, %s6278_s22   ;;  %s4650_s21 = sphi %s4770_s21, %s6277_s21   ;;  %s4646_s20 = sphi %s4768_s20, %s6276_s20  }
  0x16   : > { %s409_s24 = sshll.u32 %s4664_s13, 4  ;;  %p3566_p0 = scmp.ge.s32.totalorder %s4658_s23, 1  ;;  %s410_s24 = int_to_ptr.vmem [resolvable:$true] %s409_s24 }
  0x17   : > { %p5925_p1 = scmp.eq.s32.totalorder %s4789_s25, 0  ;;  %p396_p2 = scmp.lt.s32.totalorder %s4658_s23, 4 }
  0x18   : > { %s4665_s27 = smov [#allocation11]   ;;  %s4666_s30 = smov [#allocation14]  }
  0x19   : > { %p4794_p3 = pnand %p3566_p0, %p396_p2  ;;  %s441_s28 = sshll.u32 %s4665_s27, 4  ;;  %s4806_s28 = int_to_ptr.vmem [resolvable:$true] %s441_s28 }
  0x1a   : > { %s467_s16 = sshll.u32 %s4666_s30, 4  ;;  %s5972_s1 = sld [smem:[#allocation163_spill]]  ;;  %s4808_s16 = int_to_ptr.vmem [resolvable:$true] %s467_s16 }
  0x1b   : > { %s5970_s26 = scalar_select %p4794_p3, 1, 0 }
  0x1c   : > { %p4206_p4 = pneg %p4794_p3 }
  0x1e   : > { %p4802_p5 = pnand %p4206_p4, %p5925_p1 }
  0x20   : > { %s4346_s19 = scalar_lea.hbm %s5972_s1, 128  ;;  %p4818_p7 = pneg %p4802_p5 }
  0x21   : > { %p4347_p6 = scmp.ne.s32.totalorder %s5972_s1, %s4346_s19  ;;  %p4353_p10 = scmp.lt.u32.totalorder %s4346_s19, %s5972_s1 }
  0x23   : > { %p4349_p8 = pnand %p4818_p7, %p4347_p6 }
  0x25   : > { %p4350_p9 = pneg %p4349_p8 }
  0x27   : > { %p4355_p11 = pnand %p4353_p10, %p4350_p9 }
  0x29   : > { %4358 = shalt.err (!%p4355_p11)
}
  0x2a   : > { %s4359_s17 = scalar_lea.vmem %s410_s24, 128  ;;  %p4367_p2 = scmp.lt.s32.totalorder %s410_s24, %s410_s24 }
  0x2b   : > { %p4360_p12 = scmp.ne.s32.totalorder %s410_s24, %s4359_s17  ;;  %p4368_p4 = scmp.lt.s32.totalorder %s4359_s17, %s4359_s17 }
  0x2d   : > { %p4362_p13 = pnand %p4360_p12, %p4818_p7  ;;  %p4369_p1 = por %p4368_p4, %p4367_p2 }
  0x2f   : > { %p4363_p0 = pneg %p4362_p13 }
  0x31   : > { %p4370_p3 = pnand %p4369_p1, %p4363_p0 }
  0x33   : > { %4373 = shalt.err (!%p4370_p3)
}
  0x34   : > { %4209 = dma.hbm_to_vmem [thread:$0]  (!%p4802_p5), %s5972_s1, 128, %s410_s24, [#allocation9]  }
  0x35   : > { %s5974_s6 = sld [smem:[#allocation166_spill]] }
  0x3b   : > { %s4374_s13 = scalar_lea.hbm %s5974_s6, 2048 }
  0x3c   : > { %p4375_p6 = scmp.ne.s32.totalorder %s5974_s6, %s4374_s13  ;;  %p4381_p1 = scmp.lt.u32.totalorder %s4374_s13, %s5974_s6 }
  0x3e   : > { %p4377_p8 = pnand %p4375_p6, %p4818_p7 }
  0x40   : > { %p4378_p9 = pneg %p4377_p8 }
  0x42   : > { %p4383_p3 = pnand %p4381_p1, %p4378_p9 }
  0x44   : > { %4386 = shalt.err (!%p4383_p3)
}
  0x45   : > { %s4387_s24 = scalar_lea.vmem %s4806_s28, 2048  ;;  %p4395_p13 = scmp.lt.s32.totalorder %s4806_s28, %s4806_s28 }
  0x46   : > { %p4388_p10 = scmp.ne.s32.totalorder %s4806_s28, %s4387_s24  ;;  %p4396_p0 = scmp.lt.s32.totalorder %s4387_s24, %s4387_s24 }
  0x48   : > { %p4390_p11 = pnand %p4388_p10, %p4818_p7  ;;  %p4397_p2 = por %p4396_p0, %p4395_p13 }
  0x4a   : > { %p4391_p12 = pneg %p4390_p11 }
  0x4c   : > { %p4398_p4 = pnand %p4397_p2, %p4391_p12 }
  0x4e   : > { %4401 = shalt.err (!%p4398_p4)
}
  0x4f   : > { %s5927_s4 = smov 128   ;;  %s5929_s12 = smov 8  }
  0x50   : > { %4215 = dma.hbm_to_vmem [thread:$0]  (!%p4802_p5), %s5974_s6, 2048, %s4806_s28, [#allocation12], %s5927_s4, %s5927_s4, %s5929_s12  }
  0x51   : > { %s4402_s13 = scalar_lea.hbm %s5915_s8, 6144 }
  0x52   : > { %p4403_p6 = scmp.ne.s32.totalorder %s5915_s8, %s4402_s13  ;;  %p4409_p1 = scmp.lt.u32.totalorder %s4402_s13, %s5915_s8 }
  0x54   : > { %p4405_p8 = pnand %p4403_p6, %p4818_p7 }
  0x56   : > { %p4406_p9 = pneg %p4405_p8 }
  0x58   : > { %p4411_p3 = pnand %p4409_p1, %p4406_p9 }
  0x5a   : > { %4414 = shalt.err (!%p4411_p3)
}
  0x5b   : > { %s4415_s28 = scalar_lea.vmem %s4808_s16, 6144  ;;  %p4423_p13 = scmp.lt.s32.totalorder %s4808_s16, %s4808_s16 }
  0x5c   : > { %p4416_p10 = scmp.ne.s32.totalorder %s4808_s16, %s4415_s28  ;;  %p4424_p0 = scmp.lt.s32.totalorder %s4415_s28, %s4415_s28 }
  0x5e   : > { %p4418_p11 = pnand %p4416_p10, %p4818_p7  ;;  %p4425_p2 = por %p4424_p0, %p4423_p13 }
  0x60   : > { %p4419_p12 = pneg %p4418_p11 }
  0x62   : > { %p4426_p4 = pnand %p4425_p2, %p4419_p12 }
  0x64   : > { %4429 = shalt.err (!%p4426_p4)
}
  0x65   : > { %s4669_s15 = smov 384   ;;  %s4670_s1 = smov 24  }
  0x66   : > { %4221 = dma.hbm_to_vmem [thread:$0]  (!%p4802_p5), %s5915_s8, 6144, %s4808_s16, [#allocation15], %s4669_s15, %s4669_s15, %s4670_s1  }
  0x67   : > { %s4671_s19 = smov [#allocation10]   ;;  %s4672_s30 = smov [#allocation13]  }
  0x68   : > { %s419_s13 = sshll.u32 %s4671_s19, 4  ;;  %s454_s17 = sshll.u32 %s4672_s30, 4  ;;  %s420_s13 = int_to_ptr.vmem [resolvable:$true] %s419_s13  ;;  %s455_s17 = int_to_ptr.vmem [resolvable:$true] %s454_s17 }
  0x69   : > { %s5975_s2 = sld [smem:[#allocation164_spill]] }
  0x6f   : > { %s4430_s4 = scalar_lea.hbm %s5975_s2, 1024 }
  0x70   : > { %p4431_p6 = scmp.ne.s32.totalorder %s5975_s2, %s4430_s4  ;;  %p4437_p1 = scmp.lt.u32.totalorder %s4430_s4, %s5975_s2 }
  0x72   : > { %p4433_p8 = pnand %p4431_p6, %p4818_p7 }
  0x74   : > { %p4434_p9 = pneg %p4433_p8 }
  0x76   : > { %p4439_p3 = pnand %p4437_p1, %p4434_p9 }
  0x78   : > { %4442 = shalt.err (!%p4439_p3)
}
  0x79   : > { %s4443_s16 = scalar_lea.vmem %s420_s13, 1024  ;;  %p4451_p13 = scmp.lt.s32.totalorder %s420_s13, %s420_s13 }
  0x7a   : > { %p4444_p10 = scmp.ne.s32.totalorder %s420_s13, %s4443_s16  ;;  %p4452_p0 = scmp.lt.s32.totalorder %s4443_s16, %s4443_s16 }
  0x7c   : > { %p4446_p11 = pnand %p4444_p10, %p4818_p7  ;;  %p4453_p2 = por %p4452_p0, %p4451_p13 }
  0x7e   : > { %p4447_p12 = pneg %p4446_p11 }
  0x80   : > { %p4454_p4 = pnand %p4453_p2, %p4447_p12 }
  0x82   : > { %4457 = shalt.err (!%p4454_p4)
}
  0x83   : > { %s5976_s6 = smov 8   ;;  %s5977_s12 = smov 128  }
  0x84   : > { %4212 = dma.hbm_to_vmem [thread:$0]  (!%p4802_p5), %s5975_s2, 1024, %s420_s13, [#allocation9], %s5977_s12, %s5977_s12, %s5976_s6  }
  0x85   : > { %s4458_s14 = scalar_lea.hbm %s5914_s7, 2048 }
  0x86   : > { %p4459_p6 = scmp.ne.s32.totalorder %s5914_s7, %s4458_s14  ;;  %p4465_p1 = scmp.lt.u32.totalorder %s4458_s14, %s5914_s7 }
  0x88   : > { %p4461_p8 = pnand %p4459_p6, %p4818_p7 }
  0x8a   : > { %p4462_p9 = pneg %p4461_p8 }
  0x8c   : > { %p4467_p3 = pnand %p4465_p1, %p4462_p9 }
  0x8e   : > { %4470 = shalt.err (!%p4467_p3)
}
  0x8f   : > { %s4471_s16 = scalar_lea.vmem %s455_s17, 2048  ;;  %p4479_p13 = scmp.lt.s32.totalorder %s455_s17, %s455_s17 }
  0x90   : > { %p4472_p10 = scmp.ne.s32.totalorder %s455_s17, %s4471_s16  ;;  %p4480_p0 = scmp.lt.s32.totalorder %s4471_s16, %s4471_s16 }
  0x92   : > { %p4474_p11 = pnand %p4472_p10, %p4818_p7  ;;  %p4481_p2 = por %p4480_p0, %p4479_p13 }
  0x94   : > { %p4475_p12 = pneg %p4474_p11 }
  0x96   : > { %p4482_p4 = pnand %p4481_p2, %p4475_p12 }
  0x98   : > { %4485 = shalt.err (!%p4482_p4)
}
  0x99   : > { %4218 = dma.hbm_to_vmem [thread:$0]  (!%p4802_p5), %s5914_s7, 2048, %s455_s17, [#allocation12], %s5977_s12, %s5977_s12, %s5976_s6  }
  0x9a   : > { %s4673_s11 = smov [#allocation16]   ;;  %s4486_s19 = scalar_lea.hbm %s5916_s9, 6144 }
  0x9b   : > { %s480_s4 = sshll.u32 %s4673_s11, 4  ;;  %p4487_p6 = scmp.ne.s32.totalorder %s5916_s9, %s4486_s19  ;;  %s481_s4 = int_to_ptr.vmem [resolvable:$true] %s480_s4 }
  0x9c   : > { %p4493_p1 = scmp.lt.u32.totalorder %s4486_s19, %s5916_s9 }
  0x9d   : > { %p4489_p8 = pnand %p4487_p6, %p4818_p7 }
  0x9f   : > { %p4490_p9 = pneg %p4489_p8 }
  0xa1   : > { %p4495_p3 = pnand %p4493_p1, %p4490_p9 }
  0xa3   : > { %4498 = shalt.err (!%p4495_p3)
}
  0xa4   : > { %s4499_s17 = scalar_lea.vmem %s481_s4, 6144  ;;  %p4507_p13 = scmp.lt.s32.totalorder %s481_s4, %s481_s4 }
  0xa5   : > { %p4500_p10 = scmp.ne.s32.totalorder %s481_s4, %s4499_s17  ;;  %p4508_p0 = scmp.lt.s32.totalorder %s4499_s17, %s4499_s17 }
  0xa7   : > { %p4502_p11 = pnand %p4500_p10, %p4818_p7  ;;  %p4509_p2 = por %p4508_p0, %p4507_p13 }
  0xa9   : > { %p4503_p12 = pneg %p4502_p11 }
  0xab   : > { %p4510_p4 = pnand %p4509_p2, %p4503_p12 }
  0xad   : > { %4513 = shalt.err (!%p4510_p4)
}
  0xae   : > { %4224 = dma.hbm_to_vmem [thread:$0]  (!%p4802_p5), %s5916_s9, 6144, %s481_s4, [#allocation15], %s4669_s15, %s4669_s15, %s4670_s1  }
  0xaf   : > { %s3565_s29 = sadd.s32 4294967294, %s4658_s23   ;;  %s4951_s27 = sadd.s32 1, %s4658_s23  }
  0xb0   : > { %s44_s13 = ssub.s32 %s4658_s23, %s4951_s27  ;;  %s47_s10 = sadd.s32 1, %s4654_s22 }
  0xb1   : > { %p45_p7 = scmp.eq.s32.totalorder %s44_s13, 0  ;;  %p54_p6 = scmp.ne.s32.totalorder %s4654_s22, %s4650_s21 }
  0xb2   : > { %p55_p8 = scmp.eq.s32.totalorder %s4658_s23, 0  ;;  %p60_p9 = scmp.ne.s32.totalorder %s4650_s21, %s4646_s20 }
  0xb3   : > { %s4962_s11 = scalar_select %p45_p7, %s4654_s22, %s47_s10  }
  0xb4   : > { %p4964_p1 = por %p55_p8, %p54_p6  ;;  %p5979_p3 = scmp.eq.s32.totalorder %s4789_s25, 0 }
  0xb5   : > { %p357_p10 = scmp.eq.s32.totalorder %s4789_s25, 2  ;;  %p363_p11 = scmp.eq.s32.totalorder %s3565_s29, 2 }
  0xb6   : > { %p4970_p5 = por %p5979_p3, %p60_p9  ;;  %p4242_p12 = scmp.lt.s32.totalorder %s4658_s23, 3 }
  0xb7   : > { %s506_s1 = sand.u32 1, %s4654_s22   ;;  %p4977_p13 = por %p357_p10, %p54_p6 }
  0xb8   : > { %p4981_p0 = por %p363_p11, %p60_p9  ;;  %s3574_s19 = sshll.u32 %s506_s1, 3 }
  0xb9   : > { %s5981_s4 = scalar_select %p4977_p13, 1, 0 }
  0xba   : > { %s5982_s14 = scalar_select %p4981_p0, 1, 0 }
  0xbb   : > { %s3575_s30 = sshll.u32 %s4658_s23, 7  ;;  %s5983_s0 = sld [smem:[#allocation162_spill]] }
  0xbc   : > { %s510_s17 = scalar_lea.vmem [#allocation5], %s3574_s19  ;;  %p4995_p2 = pnand %p4242_p12, %p4964_p1 }
  0xbd   : > { %s517_s6 = sshll.u32 %s510_s17, 4  ;;  %s507_s29 = scalar_lea.sflag [#allocation6], %s506_s1  ;;  %s4991_s6 = int_to_ptr.vmem [resolvable:$true] %s517_s6 }
  0xbe   : > { %p4516_p7 = pneg %p4995_p2 }
  0xc1   : > { %s4989_s16 = scalar_lea.hbm %s5983_s0, %s3575_s30  ;;  %s4519_s30 = scalar_lea.hbm %s5983_s0, 384 }
  0xc2   : > { %s4514_s13 = scalar_lea.hbm %s4989_s16, 128  ;;  %p4520_p9 = scmp.lt.u32.totalorder %s4989_s16, %s5983_s0 }
  0xc3   : > { %p4515_p4 = scmp.ne.s32.totalorder %s4989_s16, %s4514_s13  ;;  %p4521_p1 = scmp.lt.u32.totalorder %s4519_s30, %s4514_s13 }
  0xc4   : > { %p4523_p10 = scmp.lt.u32.totalorder %s4514_s13, %s4989_s16 }
  0xc5   : > { %p4517_p6 = pnand %p4516_p7, %p4515_p4  ;;  %p4522_p3 = por %p4521_p1, %p4520_p9 }
  0xc7   : > { %p4518_p8 = pneg %p4517_p6  ;;  %p4524_p11 = por %p4523_p10, %p4522_p3 }
  0xc9   : > { %p4525_p12 = pnand %p4524_p11, %p4518_p8 }
  0xcb   : > { %4528 = shalt.err (!%p4525_p12)
}
  0xcc   : > { %s4529_s1 = scalar_lea.vmem %s4991_s6, 128  ;;  %s4674_s28 = smov [#allocation5]  }
  0xcd   : > { %p4530_p4 = scmp.ne.s32.totalorder %s4991_s6, %s4529_s1  ;;  %s4534_s17 = sshll.u32 %s4674_s28, 4  ;;  %s4535_s17 = int_to_ptr.vmem [resolvable:$false] %s4534_s17 }
  0xce   : > { %s4536_s10 = scalar_lea.vmem %s4535_s17, 256  ;;  %p4537_p13 = scmp.lt.s32.totalorder %s4991_s6, %s4535_s17 }
  0xcf   : > { %p4532_p6 = pnand %p4530_p4, %p4516_p7  ;;  %p4538_p9 = scmp.lt.s32.totalorder %s4536_s10, %s4529_s1 }
  0xd1   : > { %p4533_p0 = pneg %p4532_p6  ;;  %p4539_p1 = por %p4538_p9, %p4537_p13 }
  0xd3   : > { %p4540_p3 = pnand %p4539_p1, %p4533_p0 }
  0xd5   : > { %4543 = shalt.err (!%p4540_p3)
}
  0xd6   : > { %4228 = dma.hbm_to_vmem [thread:$0]  (!%p4995_p2), %s4989_s16, 128, %s4991_s6, %s507_s29  }
  0xd7   : > { %p5985_p8 = scmp.ne.s32.totalorder %s5970_s26, 0 }
  0xd9   : > { %526 = sbr.rel (%p5985_p8) target bundleno = 2289 (0x8f1), region = 76 }
  0xe0   : > { %s5027_s13 = sand.u32 1, %s4650_s21  }
  0xe1   : > { %s3577_s19 = sshll.u32 %s5027_s13, 3  ;;  %s529_s30 = scalar_lea.sflag [#allocation6], %s5027_s13 }
  0xe2   : > { %s532_s18 = scalar_lea.vmem [#allocation5], %s3577_s19 }
  0xe3   : > { %4621 = dma.done.wait (%p4970_p5), %s529_s30, 128  }
  0xe4   : > { %4623 = vsyncadd (%p4970_p5), %s529_s30, 4294967168  ;;  %p5986_p13 = scmp.eq.s32.totalorder %s4789_s25, 0 }
  0xe6   : > { %4625 = dma.done.wait (%p5986_p13), [#allocation9], 1152   ;;  %p5987_p0 = pmov %p5986_p13 }
  0xe8   : > { %4627 = vsyncadd (%p5987_p0), [#allocation9], 4294966144  ;;  %p5988_p2 = pmov %p5987_p0 }
  0xe9   : > { %p5989_p7 = pmov %p5987_p0 }
  0xea   : > { %4629 = dma.done.wait (%p5988_p2), [#allocation12], 4096  }
  0xeb   : > { %4631 = vsyncadd (%p5989_p7), [#allocation12], 4294963200  ;;  %p5990_p10 = pmov %p5987_p0 }
  0xec   : > { %p5991_p11 = pmov %p5987_p0 }
  0xed   : > { %4633 = dma.done.wait (%p5990_p10), [#allocation15], 12288  }
  0xee   : > { %4635 = vsyncadd (%p5991_p11), [#allocation15], 4294955008  ;;  %v608_v1 = vld [vmem:[#allocation8] sm:$0xff]  ;;  %v610_v2 = vld [vmem:[%s532_s18] sm:$0xff]  ;;  %s6123_s24 = sld [smem:[#allocation167_spill]]  ;;  %s6126_s17 = sld [smem:[#allocation168_spill]] }
  0xef   : > { %v5047_v3 = vld [vmem:[#allocation10] sm:$0xff]  ;;  %609 = vst [vmem:[#allocation2] sm:$0xff] %v608_v1  ;;  %611 = vst [vmem:[#allocation3] sm:$0xff] %v610_v2  ;;  %v5049_v4 = vld [vmem:[#allocation10 + $0x8] sm:$0xff]  ;;  %s6128_s30 = sld [smem:[#allocation169_spill]]  ;;  %s6131_s15 = sld [smem:[#allocation165_spill]] }
  0xf0   : > { %5992 = vst [vmem:[#allocation26_spill] sm:$0xff] %v5047_v3  ;;  %5993 = vst [vmem:[#allocation27_spill] sm:$0xff] %v5049_v4  ;;  %v5051_v5 = vld [vmem:[#allocation10 + $0x10] sm:$0xff]  ;;  %v5053_v6 = vld [vmem:[#allocation10 + $0x18] sm:$0xff]  ;;  %s3584_s16 = sshll.u32 %s5027_s13, 5  ;;  %s5411_s29 = smov 0  }
  0xf1   : > { %5994 = vst [vmem:[#allocation28_spill] sm:$0xff] %v5051_v5  ;;  %5995 = vst [vmem:[#allocation29_spill] sm:$0xff] %v5053_v6  ;;  %v5055_v7 = vld [vmem:[#allocation10 + $0x20] sm:$0xff]  ;;  %v5057_v8 = vld [vmem:[#allocation10 + $0x28] sm:$0xff]  ;;  %s5405_s6 = scalar_lea.vmem [#allocation17], %s3584_s16  ;;  %s5409_s12 = scalar_lea.vmem [#allocation18], %s3584_s16 }
  0xf2   : > { %5996 = vst [vmem:[#allocation30_spill] sm:$0xff] %v5055_v7  ;;  %5997 = vst [vmem:[#allocation31_spill] sm:$0xff] %v5057_v8  ;;  %v5059_v9 = vld [vmem:[#allocation10 + $0x30] sm:$0xff]  ;;  %v5061_v10 = vld [vmem:[#allocation10 + $0x38] sm:$0xff] }
  0xf3   : > { %5998 = vst [vmem:[#allocation32_spill] sm:$0xff] %v5059_v9  ;;  %5999 = vst [vmem:[#allocation33_spill] sm:$0xff] %v5061_v10  ;;  %v5066_v11 = vld [vmem:[%s5910_s3] sm:$0xff]  ;;  %v5073_v13 = vld [vmem:[#allocation11] sm:$0xff] }
  0xf4   : > { %6000 = vst [vmem:[#allocation34_spill] sm:$0xff] %v5066_v11  ;;  %v5071_v12 = vld [vmem:[%s5912_s5] ss:$0 sm:$0xff]  ;;  %6002 = vst [vmem:[#allocation36_spill] sm:$0xff] %v5073_v13  ;;  %v5075_v14 = vld [vmem:[#allocation11 + $0x8] sm:$0xff] }
  0xf5   : > { %6001 = vst [vmem:[#allocation35_spill] sm:$0xff] %v5071_v12  ;;  %6003 = vst [vmem:[#allocation37_spill] sm:$0xff] %v5075_v14  ;;  %v5077_v15 = vld [vmem:[#allocation11 + $0x10] sm:$0xff]  ;;  %v5079_v16 = vld [vmem:[#allocation11 + $0x18] sm:$0xff] }
  0xf6   : > { %6004 = vst [vmem:[#allocation38_spill] sm:$0xff] %v5077_v15  ;;  %6005 = vst [vmem:[#allocation39_spill] sm:$0xff] %v5079_v16  ;;  %v5081_v17 = vld [vmem:[#allocation11 + $0x20] sm:$0xff]  ;;  %v5083_v18 = vld [vmem:[#allocation11 + $0x28] sm:$0xff] }
  0xf7   : > { %6006 = vst [vmem:[#allocation40_spill] sm:$0xff] %v5081_v17  ;;  %6007 = vst [vmem:[#allocation41_spill] sm:$0xff] %v5083_v18  ;;  %v5085_v19 = vld [vmem:[#allocation11 + $0x30] sm:$0xff]  ;;  %v5087_v20 = vld [vmem:[#allocation11 + $0x38] sm:$0xff] }
  0xf8   : > { %6008 = vst [vmem:[#allocation42_spill] sm:$0xff] %v5085_v19  ;;  %6009 = vst [vmem:[#allocation43_spill] sm:$0xff] %v5087_v20  ;;  %v5089_v21 = vld [vmem:[#allocation11 + $0x40] sm:$0xff]  ;;  %v5091_v22 = vld [vmem:[#allocation11 + $0x48] sm:$0xff] }
  0xf9   : > { %6010 = vst [vmem:[#allocation44_spill] sm:$0xff] %v5089_v21  ;;  %6011 = vst [vmem:[#allocation45_spill] sm:$0xff] %v5091_v22  ;;  %v5093_v23 = vld [vmem:[#allocation11 + $0x50] sm:$0xff]  ;;  %v5095_v24 = vld [vmem:[#allocation11 + $0x58] sm:$0xff] }
  0xfa   : > { %6012 = vst [vmem:[#allocation46_spill] sm:$0xff] %v5093_v23  ;;  %6013 = vst [vmem:[#allocation47_spill] sm:$0xff] %v5095_v24  ;;  %v5097_v25 = vld [vmem:[#allocation11 + $0x60] sm:$0xff]  ;;  %v5099_v26 = vld [vmem:[#allocation11 + $0x68] sm:$0xff] }
  0xfb   : > { %6014 = vst [vmem:[#allocation48_spill] sm:$0xff] %v5097_v25  ;;  %6015 = vst [vmem:[#allocation49_spill] sm:$0xff] %v5099_v26  ;;  %v5101_v27 = vld [vmem:[#allocation11 + $0x70] sm:$0xff]  ;;  %v5103_v28 = vld [vmem:[#allocation11 + $0x78] sm:$0xff] }
  0xfc   : > { %6016 = vst [vmem:[#allocation50_spill] sm:$0xff] %v5101_v27  ;;  %6017 = vst [vmem:[#allocation51_spill] sm:$0xff] %v5103_v28  ;;  %v5105_v29 = vld [vmem:[#allocation13] sm:$0xff]  ;;  %v5107_v30 = vld [vmem:[#allocation13 + $0x8] sm:$0xff] }
  0xfd   : > { %6018 = vst [vmem:[#allocation52_spill] sm:$0xff] %v5105_v29  ;;  %6019 = vst [vmem:[#allocation53_spill] sm:$0xff] %v5107_v30  ;;  %v5109_v31 = vld [vmem:[#allocation13 + $0x10] sm:$0xff]  ;;  %v5111_v32 = vld [vmem:[#allocation13 + $0x18] sm:$0xff] }
  0xfe   : > { %6020 = vst [vmem:[#allocation54_spill] sm:$0xff] %v5109_v31  ;;  %6021 = vst [vmem:[#allocation55_spill] sm:$0xff] %v5111_v32  ;;  %v5113_v33 = vld [vmem:[#allocation13 + $0x20] sm:$0xff]  ;;  %v5115_v34 = vld [vmem:[#allocation13 + $0x28] sm:$0xff] }
  0xff   : > { %6022 = vst [vmem:[#allocation56_spill] sm:$0xff] %v5113_v33  ;;  %6023 = vst [vmem:[#allocation57_spill] sm:$0xff] %v5115_v34  ;;  %v5117_v35 = vld [vmem:[#allocation13 + $0x30] sm:$0xff]  ;;  %v5119_v36 = vld [vmem:[#allocation13 + $0x38] sm:$0xff] }
 0x100   : > { %6024 = vst [vmem:[#allocation58_spill] sm:$0xff] %v5117_v35  ;;  %6025 = vst [vmem:[#allocation59_spill] sm:$0xff] %v5119_v36  ;;  %v5121_v37 = vld [vmem:[#allocation13 + $0x40] sm:$0xff]  ;;  %v5123_v38 = vld [vmem:[#allocation13 + $0x48] sm:$0xff] }
 0x101   : > { %6026 = vst [vmem:[#allocation60_spill] sm:$0xff] %v5121_v37  ;;  %6027 = vst [vmem:[#allocation61_spill] sm:$0xff] %v5123_v38  ;;  %v5125_v39 = vld [vmem:[#allocation13 + $0x50] sm:$0xff]  ;;  %v5127_v40 = vld [vmem:[#allocation13 + $0x58] sm:$0xff] }
 0x102   : > { %6028 = vst [vmem:[#allocation62_spill] sm:$0xff] %v5125_v39  ;;  %6029 = vst [vmem:[#allocation63_spill] sm:$0xff] %v5127_v40  ;;  %v5129_v41 = vld [vmem:[#allocation13 + $0x60] sm:$0xff]  ;;  %v5131_v42 = vld [vmem:[#allocation13 + $0x68] sm:$0xff] }
 0x103   : > { %6030 = vst [vmem:[#allocation64_spill] sm:$0xff] %v5129_v41  ;;  %6031 = vst [vmem:[#allocation65_spill] sm:$0xff] %v5131_v42  ;;  %v5133_v43 = vld [vmem:[#allocation13 + $0x70] sm:$0xff]  ;;  %v5135_v44 = vld [vmem:[#allocation13 + $0x78] sm:$0xff] }
 0x104   : > { %6032 = vst [vmem:[#allocation66_spill] sm:$0xff] %v5133_v43  ;;  %6033 = vst [vmem:[#allocation67_spill] sm:$0xff] %v5135_v44  ;;  %v5137_v45 = vld [vmem:[#allocation14] sm:$0xff]  ;;  %v5139_v46 = vld [vmem:[#allocation14 + $0x8] sm:$0xff] }
 0x105   : > { %6034 = vst [vmem:[#allocation68_spill] sm:$0xff] %v5137_v45  ;;  %6035 = vst [vmem:[#allocation69_spill] sm:$0xff] %v5139_v46  ;;  %v5141_v47 = vld [vmem:[#allocation14 + $0x10] sm:$0xff]  ;;  %v5143_v48 = vld [vmem:[#allocation14 + $0x18] sm:$0xff] }
 0x106   : > { %6036 = vst [vmem:[#allocation70_spill] sm:$0xff] %v5141_v47  ;;  %6037 = vst [vmem:[#allocation71_spill] sm:$0xff] %v5143_v48  ;;  %v5145_v49 = vld [vmem:[#allocation14 + $0x20] sm:$0xff]  ;;  %v5147_v50 = vld [vmem:[#allocation14 + $0x28] sm:$0xff] }
 0x107   : > { %6038 = vst [vmem:[#allocation72_spill] sm:$0xff] %v5145_v49  ;;  %6039 = vst [vmem:[#allocation73_spill] sm:$0xff] %v5147_v50  ;;  %v5149_v51 = vld [vmem:[#allocation14 + $0x30] sm:$0xff]  ;;  %v5151_v52 = vld [vmem:[#allocation14 + $0x38] sm:$0xff] }
 0x108   : > { %6040 = vst [vmem:[#allocation74_spill] sm:$0xff] %v5149_v51  ;;  %6041 = vst [vmem:[#allocation75_spill] sm:$0xff] %v5151_v52  ;;  %v5153_v53 = vld [vmem:[#allocation14 + $0x40] sm:$0xff]  ;;  %v5155_v54 = vld [vmem:[#allocation14 + $0x48] sm:$0xff] }
 0x109   : > { %6042 = vst [vmem:[#allocation76_spill] sm:$0xff] %v5153_v53  ;;  %v5157_v55 = vld [vmem:[#allocation14 + $0x50] sm:$0xff]  ;;  %v5159_v56 = vld [vmem:[#allocation14 + $0x58] sm:$0xff]  ;;  %v5161_v57 = vld [vmem:[#allocation14 + $0x60] sm:$0xff] }
 0x10a   : > { %v5163_v58 = vld [vmem:[#allocation14 + $0x68] sm:$0xff]  ;;  %v5165_v59 = vld [vmem:[#allocation14 + $0x70] sm:$0xff]  ;;  %v5167_v60 = vld [vmem:[#allocation14 + $0x78] sm:$0xff] }
 0x10b   : > { %v5169_v61 = vld [vmem:[#allocation14 + $0x80] sm:$0xff]  ;;  %v5171_v62 = vld [vmem:[#allocation14 + $0x88] sm:$0xff]  ;;  %v5173_v63 = vld [vmem:[#allocation14 + $0x90] sm:$0xff] }
 0x10c   : > { %v5175_v0 = vld [vmem:[#allocation14 + $0x98] sm:$0xff]  ;;  %v5177_v1 = vld [vmem:[#allocation14 + $0xa0] sm:$0xff]  ;;  %v5179_v2 = vld [vmem:[#allocation14 + $0xa8] sm:$0xff] }
 0x10d   : > { %6043 = vst [vmem:[#allocation77_spill] sm:$0xff] %v5175_v0  ;;  %6044 = vst [vmem:[#allocation78_spill] sm:$0xff] %v5177_v1  ;;  %v5181_v28 = vld [vmem:[#allocation14 + $0xb0] sm:$0xff]  ;;  %v5183_v27 = vld [vmem:[#allocation14 + $0xb8] sm:$0xff] }
 0x10e   : > { %6045 = vst [vmem:[#allocation79_spill] sm:$0xff] %v5179_v2  ;;  %6046 = vst [vmem:[#allocation80_spill] sm:$0xff] %v5181_v28  ;;  %v5185_v26 = vld [vmem:[#allocation14 + $0xc0] sm:$0xff]  ;;  %v5187_v25 = vld [vmem:[#allocation14 + $0xc8] sm:$0xff] }
 0x10f   : > { %6047 = vst [vmem:[#allocation81_spill] sm:$0xff] %v5183_v27  ;;  %6048 = vst [vmem:[#allocation82_spill] sm:$0xff] %v5185_v26  ;;  %v5189_v24 = vld [vmem:[#allocation14 + $0xd0] sm:$0xff]  ;;  %v5191_v23 = vld [vmem:[#allocation14 + $0xd8] sm:$0xff] }
 0x110   : > { %6049 = vst [vmem:[#allocation83_spill] sm:$0xff] %v5187_v25  ;;  %6050 = vst [vmem:[#allocation84_spill] sm:$0xff] %v5189_v24  ;;  %v5193_v22 = vld [vmem:[#allocation14 + $0xe0] sm:$0xff]  ;;  %v5195_v21 = vld [vmem:[#allocation14 + $0xe8] sm:$0xff] }
 0x111   : > { %6051 = vst [vmem:[#allocation85_spill] sm:$0xff] %v5191_v23  ;;  %6052 = vst [vmem:[#allocation86_spill] sm:$0xff] %v5193_v22  ;;  %v5197_v20 = vld [vmem:[#allocation14 + $0xf0] sm:$0xff]  ;;  %v5199_v19 = vld [vmem:[#allocation14 + $0xf8] sm:$0xff] }
 0x112   : > { %6053 = vst [vmem:[#allocation87_spill] sm:$0xff] %v5195_v21  ;;  %6054 = vst [vmem:[#allocation88_spill] sm:$0xff] %v5197_v20  ;;  %v5201_v18 = vld [vmem:[#allocation14 + $0x100] sm:$0xff]  ;;  %v5203_v17 = vld [vmem:[#allocation14 + $0x108] sm:$0xff] }
 0x113   : > { %6055 = vst [vmem:[#allocation89_spill] sm:$0xff] %v5199_v19  ;;  %6056 = vst [vmem:[#allocation90_spill] sm:$0xff] %v5201_v18  ;;  %v5205_v16 = vld [vmem:[#allocation14 + $0x110] sm:$0xff]  ;;  %v5207_v15 = vld [vmem:[#allocation14 + $0x118] sm:$0xff] }
 0x114   : > { %6057 = vst [vmem:[#allocation91_spill] sm:$0xff] %v5203_v17  ;;  %6058 = vst [vmem:[#allocation92_spill] sm:$0xff] %v5205_v16  ;;  %v5209_v14 = vld [vmem:[#allocation14 + $0x120] sm:$0xff]  ;;  %v5211_v13 = vld [vmem:[#allocation14 + $0x128] sm:$0xff] }
 0x115   : > { %6059 = vst [vmem:[#allocation93_spill] sm:$0xff] %v5207_v15  ;;  %6060 = vst [vmem:[#allocation94_spill] sm:$0xff] %v5209_v14  ;;  %v5213_v11 = vld [vmem:[#allocation14 + $0x130] sm:$0xff]  ;;  %v5215_v12 = vld [vmem:[#allocation14 + $0x138] sm:$0xff] }
 0x116   : > { %6061 = vst [vmem:[#allocation95_spill] sm:$0xff] %v5211_v13  ;;  %6062 = vst [vmem:[#allocation96_spill] sm:$0xff] %v5213_v11  ;;  %v5217_v10 = vld [vmem:[#allocation14 + $0x140] sm:$0xff]  ;;  %v5219_v9 = vld [vmem:[#allocation14 + $0x148] sm:$0xff] }
 0x117   : > { %6063 = vst [vmem:[#allocation97_spill] sm:$0xff] %v5215_v12  ;;  %6064 = vst [vmem:[#allocation98_spill] sm:$0xff] %v5217_v10  ;;  %v5221_v8 = vld [vmem:[#allocation14 + $0x150] sm:$0xff]  ;;  %v5223_v7 = vld [vmem:[#allocation14 + $0x158] sm:$0xff] }
 0x118   : > { %6065 = vst [vmem:[#allocation99_spill] sm:$0xff] %v5219_v9  ;;  %6066 = vst [vmem:[#allocation100_spill] sm:$0xff] %v5221_v8  ;;  %v5225_v6 = vld [vmem:[#allocation14 + $0x160] sm:$0xff]  ;;  %v5227_v5 = vld [vmem:[#allocation14 + $0x168] sm:$0xff] }
 0x119   : > { %6067 = vst [vmem:[#allocation101_spill] sm:$0xff] %v5223_v7  ;;  %6068 = vst [vmem:[#allocation102_spill] sm:$0xff] %v5225_v6  ;;  %v5229_v4 = vld [vmem:[#allocation14 + $0x170] sm:$0xff]  ;;  %v5231_v44 = vld [vmem:[#allocation14 + $0x178] sm:$0xff] }
 0x11a   : > { %6069 = vst [vmem:[#allocation103_spill] sm:$0xff] %v5227_v5  ;;  %6070 = vst [vmem:[#allocation104_spill] sm:$0xff] %v5229_v4  ;;  %v5233_v43 = vld [vmem:[#allocation16] sm:$0xff]  ;;  %v5235_v42 = vld [vmem:[#allocation16 + $0x8] sm:$0xff] }
 0x11b   : > { %6071 = vst [vmem:[#allocation105_spill] sm:$0xff] %v5231_v44  ;;  %6072 = vst [vmem:[#allocation106_spill] sm:$0xff] %v5233_v43  ;;  %v5237_v41 = vld [vmem:[#allocation16 + $0x10] sm:$0xff]  ;;  %v5239_v40 = vld [vmem:[#allocation16 + $0x18] sm:$0xff] }
 0x11c   : > { %6073 = vst [vmem:[#allocation107_spill] sm:$0xff] %v5235_v42  ;;  %6074 = vst [vmem:[#allocation108_spill] sm:$0xff] %v5237_v41  ;;  %v5241_v39 = vld [vmem:[#allocation16 + $0x20] sm:$0xff]  ;;  %v5243_v38 = vld [vmem:[#allocation16 + $0x28] sm:$0xff] }
 0x11d   : > { %6075 = vst [vmem:[#allocation109_spill] sm:$0xff] %v5239_v40  ;;  %6076 = vst [vmem:[#allocation110_spill] sm:$0xff] %v5241_v39  ;;  %v5245_v37 = vld [vmem:[#allocation16 + $0x30] sm:$0xff]  ;;  %v5247_v36 = vld [vmem:[#allocation16 + $0x38] sm:$0xff] }
 0x11e   : > { %6077 = vst [vmem:[#allocation111_spill] sm:$0xff] %v5243_v38  ;;  %6078 = vst [vmem:[#allocation112_spill] sm:$0xff] %v5245_v37  ;;  %v5249_v35 = vld [vmem:[#allocation16 + $0x40] sm:$0xff]  ;;  %v5251_v34 = vld [vmem:[#allocation16 + $0x48] sm:$0xff] }
 0x11f   : > { %6079 = vst [vmem:[#allocation113_spill] sm:$0xff] %v5247_v36  ;;  %6080 = vst [vmem:[#allocation114_spill] sm:$0xff] %v5249_v35  ;;  %v5253_v33 = vld [vmem:[#allocation16 + $0x50] sm:$0xff]  ;;  %v5255_v32 = vld [vmem:[#allocation16 + $0x58] sm:$0xff] }
 0x120   : > { %6081 = vst [vmem:[#allocation115_spill] sm:$0xff] %v5251_v34  ;;  %6082 = vst [vmem:[#allocation116_spill] sm:$0xff] %v5253_v33  ;;  %v5257_v31 = vld [vmem:[#allocation16 + $0x60] sm:$0xff]  ;;  %v5259_v30 = vld [vmem:[#allocation16 + $0x68] sm:$0xff] }
 0x121   : > { %6083 = vst [vmem:[#allocation117_spill] sm:$0xff] %v5255_v32  ;;  %6084 = vst [vmem:[#allocation118_spill] sm:$0xff] %v5257_v31  ;;  %v5261_v29 = vld [vmem:[#allocation16 + $0x70] sm:$0xff]  ;;  %v5263_v3 = vld [vmem:[#allocation16 + $0x78] sm:$0xff]  ;;  %v755_v32 = vlaneseq }
 0x122   : > { %6085 = vst [vmem:[#allocation119_spill] sm:$0xff] %v5259_v30  ;;  %6086 = vst [vmem:[#allocation120_spill] sm:$0xff] %v5261_v29  ;;  %v5265_v38 = vld [vmem:[#allocation16 + $0x80] sm:$0xff]  ;;  %v5267_v37 = vld [vmem:[#allocation16 + $0x88] sm:$0xff] }
 0x123   : > { %6087 = vst [vmem:[#allocation121_spill] sm:$0xff] %v5263_v3  ;;  %6088 = vst [vmem:[#allocation122_spill] sm:$0xff] %v5265_v38  ;;  %v5269_v41 = vld [vmem:[#allocation16 + $0x90] sm:$0xff]  ;;  %v5271_v35 = vld [vmem:[#allocation16 + $0x98] sm:$0xff] }
 0x124   : > { %6089 = vst [vmem:[#allocation123_spill] sm:$0xff] %v5267_v37  ;;  %6090 = vst [vmem:[#allocation124_spill] sm:$0xff] %v5269_v41  ;;  %v5273_v34 = vld [vmem:[#allocation16 + $0xa0] sm:$0xff]  ;;  %v5275_v33 = vld [vmem:[#allocation16 + $0xa8] sm:$0xff] }
 0x125   : > { %6091 = vst [vmem:[#allocation125_spill] sm:$0xff] %v5271_v35  ;;  %6092 = vst [vmem:[#allocation126_spill] sm:$0xff] %v5273_v34  ;;  %v5277_v31 = vld [vmem:[#allocation16 + $0xb0] sm:$0xff]  ;;  %v5279_v30 = vld [vmem:[#allocation16 + $0xb8] sm:$0xff] }
 0x126   : > { %6093 = vst [vmem:[#allocation127_spill] sm:$0xff] %v5275_v33  ;;  %6094 = vst [vmem:[#allocation128_spill] sm:$0xff] %v5277_v31  ;;  %v5281_v29 = vld [vmem:[#allocation16 + $0xc0] sm:$0xff]  ;;  %v5283_v3 = vld [vmem:[#allocation16 + $0xc8] sm:$0xff] }
 0x127   : > { %6095 = vst [vmem:[#allocation129_spill] sm:$0xff] %v5279_v30  ;;  %6096 = vst [vmem:[#allocation130_spill] sm:$0xff] %v5281_v29  ;;  %v5285_v38 = vld [vmem:[#allocation16 + $0xd0] sm:$0xff]  ;;  %v5287_v37 = vld [vmem:[#allocation16 + $0xd8] sm:$0xff]  ;;  %v5301_v30 = vshrl.u32 %v755_v32, 7 }
 0x128   : > { %6097 = vst [vmem:[#allocation131_spill] sm:$0xff] %v5283_v3  ;;  %6098 = vst [vmem:[#allocation132_spill] sm:$0xff] %v5285_v38  ;;  %v5289_v41 = vld [vmem:[#allocation16 + $0xe0] sm:$0xff]  ;;  %v5291_v35 = vld [vmem:[#allocation16 + $0xe8] sm:$0xff] }
 0x129   : > { %6099 = vst [vmem:[#allocation133_spill] sm:$0xff] %v5287_v37  ;;  %6100 = vst [vmem:[#allocation134_spill] sm:$0xff] %v5289_v41  ;;  %v5293_v34 = vld [vmem:[#allocation16 + $0xf0] sm:$0xff]  ;;  %v5295_v33 = vld [vmem:[#allocation16 + $0xf8] sm:$0xff]  ;;  %v792_v43 = vsub.s32 5, %v5301_v30  ;;  %v806_v6 = vsub.s32 7, %v5301_v30 }
 0x12a   : > { %6101 = vst [vmem:[#allocation135_spill] sm:$0xff] %v5291_v35  ;;  %6102 = vst [vmem:[#allocation136_spill] sm:$0xff] %v5293_v34  ;;  %v5297_v36 = vld [vmem:[#allocation16 + $0x100] sm:$0xff]  ;;  %v5299_v31 = vld [vmem:[#allocation16 + $0x108] sm:$0xff] }
 0x12b   : > { %6103 = vst [vmem:[#allocation137_spill] sm:$0xff] %v5295_v33  ;;  %6104 = vst [vmem:[#allocation138_spill] sm:$0xff] %v5297_v36  ;;  %v5303_v29 = vld [vmem:[#allocation16 + $0x110] sm:$0xff]  ;;  %v5305_v3 = vld [vmem:[#allocation16 + $0x118] sm:$0xff] }
 0x12c   : > { %6105 = vst [vmem:[#allocation139_spill] sm:$0xff] %v5299_v31  ;;  %6106 = vst [vmem:[#allocation140_spill] sm:$0xff] %v5301_v30  ;;  %v5307_v38 = vld [vmem:[#allocation16 + $0x120] sm:$0xff]  ;;  %v5309_v37 = vld [vmem:[#allocation16 + $0x128] sm:$0xff] }
 0x12d   : > { %6107 = vst [vmem:[#allocation141_spill] sm:$0xff] %v5303_v29  ;;  %6108 = vst [vmem:[#allocation142_spill] sm:$0xff] %v5305_v3  ;;  %v5311_v41 = vld [vmem:[#allocation16 + $0x130] sm:$0xff]  ;;  %v5313_v35 = vld [vmem:[#allocation16 + $0x138] sm:$0xff] }
 0x12e   : > { %6109 = vst [vmem:[#allocation143_spill] sm:$0xff] %v5307_v38  ;;  %6110 = vst [vmem:[#allocation144_spill] sm:$0xff] %v5309_v37  ;;  %v5315_v34 = vld [vmem:[#allocation16 + $0x140] sm:$0xff]  ;;  %v5317_v33 = vld [vmem:[#allocation16 + $0x148] sm:$0xff]  ;;  %v5328_v38 = vsub.s32 2, %v5301_v30 }
 0x12f   : > { %6111 = vst [vmem:[#allocation145_spill] sm:$0xff] %v5311_v41  ;;  %6112 = vst [vmem:[#allocation146_spill] sm:$0xff] %v5313_v35  ;;  %v5319_v36 = vld [vmem:[#allocation16 + $0x150] sm:$0xff]  ;;  %v5321_v31 = vld [vmem:[#allocation16 + $0x158] sm:$0xff]  ;;  %v5331_v41 = vsub.s32 0, %v5301_v30 }
 0x130   : > { %6113 = vst [vmem:[#allocation147_spill] sm:$0xff] %v5315_v34  ;;  %6114 = vst [vmem:[#allocation148_spill] sm:$0xff] %v5317_v33  ;;  %v5323_v29 = vld [vmem:[#allocation16 + $0x160] sm:$0xff]  ;;  %v5325_v3 = vld [vmem:[#allocation16 + $0x168] sm:$0xff]  ;;  %v778_v33 = vsub.s32 3, %v5301_v30 }
 0x131   : > { %6115 = vst [vmem:[#allocation149_spill] sm:$0xff] %v5319_v36  ;;  %6116 = vst [vmem:[#allocation150_spill] sm:$0xff] %v5321_v31  ;;  %v5333_v35 = vld [vmem:[#allocation16 + $0x170] sm:$0xff]  ;;  %v5335_v34 = vld [vmem:[#allocation16 + $0x178] sm:$0xff] }
 0x132   : > { %6117 = vst [vmem:[#allocation151_spill] sm:$0xff] %v5323_v29  ;;  %6118 = vst [vmem:[#allocation152_spill] sm:$0xff] %v5325_v3  ;;  %v5340_v36 = vld [vmem:[%s6123_s24] sm:$0x7]  ;;  %v5344_v29 = vsub.s32 1, %v5301_v30 }
 0x133   : > { %6119 = vst [vmem:[#allocation153_spill] sm:$0xff] %v5328_v38  ;;  %6120 = vst [vmem:[#allocation154_spill] sm:$0xff] %v5331_v41  ;;  %v5349_v3 = vld [vmem:[%s6126_s17] sm:$0x7] }
 0x134   : > { %6121 = vst [vmem:[#allocation155_spill] sm:$0xff] %v5333_v35  ;;  %6122 = vst [vmem:[#allocation156_spill] sm:$0xff] %v5335_v34  ;;  %v5354_v35 = vld [vmem:[%s6128_s30] sm:$0x7]  ;;  %v5356_v34 = vld [vmem:[#allocation4] ss:$0 sm:$0xff] }
 0x135   : > { %6124 = vst [vmem:[#allocation157_spill] sm:$0xff] %v5340_v36  ;;  %6125 = vst [vmem:[#allocation158_spill] sm:$0xff] %v5344_v29  ;;  %v754_v36 = vld [vmem:[%s6131_s15] sm:$0xff] }
 0x136   : > { %6127 = vst [vmem:[#allocation159_spill] sm:$0xff] %v5349_v3  ;;  %6129 = vst [vmem:[#allocation160_spill] sm:$0xff] %v5354_v35  ;;  %v772_v31 = vrot.slane %v754_v36, %v5328_v38  ;;  %v758_v37 = vrot.slane %v754_v36, %v5331_v41  ;;  %v779_v40 = vrot.slane %v754_v36, %v778_v33  ;;  %v785_v35 = vsub.s32 4, %v5301_v30 }
 0x137   : > { %6130 = vst [vmem:[#allocation161_spill] sm:$0xff] %v5356_v34  ;;  %v765_v3 = vrot.slane %v754_v36, %v5344_v29  ;;  %v793_v34 = vrot.slane %v754_v36, %v792_v43  ;;  %v799_v38 = vsub.s32 6, %v5301_v30  ;;  %v807_v41 = vrot.slane %v754_v36, %v806_v6 }
 0x138   : > { %774 = vbcast.lane.b32.xlu1 %v772_v31, 256  ;;  %760 = vbcast.lane.b32.xlu0 %v758_v37, 256  ;;  %v786_v44 = vrot.slane %v754_v36, %v785_v35  ;;  %v5369_v33 = vand.u32 127, %v755_v32 }
 0x139   : > { %v800_v31 = vrot.slane %v754_v36, %v799_v38 }
 0x13c   : > { %781 = vbcast.lane.b32.xlu1 %v779_v40, 256  ;;  %767 = vbcast.lane.b32.xlu0 %v765_v3, 256 }
 0x140   : > { %795 = vbcast.lane.b32.xlu1 %v793_v34, 256  ;;  %788 = vbcast.lane.b32.xlu0 %v786_v44, 256 }
 0x144   : > { %809 = vbcast.lane.b32.xlu1 %v807_v41, 256  ;;  %802 = vbcast.lane.b32.xlu0 %v800_v31, 256 }
 0x1aa   : > { %v5371_v37 = vpop.permute.xlu1 %774  ;;  %v5373_v29 = vpop.permute.xlu0 %760 }
 0x1ab   : > { %vm813_vm1 = vcmp.eq.s32.totalorder %v5373_v29, %v5369_v33 }
 0x1ae   : > { %v5379_v3 = vpop.permute.xlu1 %781  ;;  %v5381_v6 = vpop.permute.xlu0 %767 }
 0x1af   : > { %vm816_vm2 = vcmp.eq.s32.totalorder %v5379_v3, %v5369_v33  ;;  %vm814_vm3 = vcmp.eq.s32.totalorder %v5381_v6, %v5369_v33 }
 0x1b2   : > { %v5387_v32 = vpop.permute.xlu1 %795  ;;  %v5389_v34 = vpop.permute.xlu0 %788 }
 0x1b3   : > { %vm818_vm4 = vcmp.eq.s32.totalorder %v5387_v32, %v5369_v33  ;;  %vm817_vm5 = vcmp.eq.s32.totalorder %v5389_v34, %v5369_v33 }
 0x1b6   : > { %v5395_v35 = vpop.permute.xlu1 %809  ;;  %v5397_v36 = vpop.permute.xlu0 %802 }
 0x1b7   : > { %vm819_vm7 = vcmp.eq.s32.totalorder %v5397_v36, %v5369_v33 }
 0x1b8 LB: >> { %v6132_v46 = vld [vmem:[#allocation69_spill] sm:$0xff]  ;;  %v6133_v49 = vld [vmem:[#allocation72_spill] sm:$0xff]  ;;  %v6135_v48 = vld [vmem:[#allocation71_spill] sm:$0xff]  ;;  %v4020_v44 = vpack.c.bf16 %v5169_v61, %v5163_v58  ;;  %v5952_v31 = vmov 0.0|0.0   ;;  %vm4677_vm8 = vmmov 0   ;;  %s3596_s24 = sshll.u32 %s4662_s29, 3  ;;  %vm6252_vm0 = vcmp.eq.s32.totalorder %v5371_v37, %v5369_v33  ;;  %s4662_s29 = sphi %s5411_s29, %s842_s29  }
 0x1b9   : >> { %v4012_v38 = vpack.c.bf16 %v6133_v49, %v6132_v46  ;;  %v6134_v45 = vld [vmem:[#allocation68_spill] sm:$0xff]  ;;  %v6136_v52 = vld [vmem:[#allocation75_spill] sm:$0xff]  ;;  %v6137_v51 = vld [vmem:[#allocation74_spill] sm:$0xff]  ;;  %4044 = vmatprep.subr.bf16.mxu1 %v5952_v31  ;;  %v5950_v49 = vmov 0.0   ;;  %s1179_s1 = scalar_lea.vmem %s5409_s12, %s3596_s24 [#allocation18]  ;;  %vm1917_vm9 = vcmask 1041409   ;;  %vm1920_vm10 = vcmask 1042434   ;;  %s3280_s28 = scalar_lea.vmem %s5405_s6, %s3596_s24 [#allocation17] }
 0x1ba   : >> { %v4014_v40 = vpack.c.bf16 %v6135_v48, %v6134_v45  ;;  %v4016_v41 = vpack.c.bf16 %v5157_v55, %v6136_v52  ;;  %v4018_v43 = vpack.c.bf16 %v5155_v54, %v6137_v51  ;;  %v6138_v47 = vld [vmem:[#allocation70_spill] sm:$0xff]  ;;  %v6139_v50 = vld [vmem:[#allocation73_spill] sm:$0xff]  ;;  %909 = vmatprep.mubr.f32.mxu0 %v5950_v49  ;;  %v6140_v53 = vld [vmem:[#allocation76_spill] sm:$0xff]  ;;  %3784 = vmatprep.mubr.msk.f32.mxu1 %vm4677_vm8, %v5950_v49  ;;  %vm1923_vm11 = vcmask 1043459   ;;  %s842_s29 = sadd.s32 1, %s4662_s29  }
 0x1bb   : >> { %4013 = vmatprep.subr.bf16.mxu0 %v4012_v38  ;;  %v4045_v46 = vpack.c.bf16 %v6139_v50, %v6138_v47  ;;  %v4048_v38 = vpack.c.bf16 %v5159_v56, %v6140_v53  ;;  %v6141_v0 = vld [vmem:[#allocation77_spill] sm:$0xff]  ;;  %v6142_v28 = vld [vmem:[#allocation80_spill] sm:$0xff]  ;;  %v6143_v2 = vld [vmem:[#allocation79_spill] sm:$0xff]  ;;  %vm1926_vm12 = vcmask 1044484   ;;  %vm1929_vm13 = vcmask 1045509   ;;  %p839_p5 = scmp.ge.s32.totalorder %s842_s29, 4  }
 0x1bc   : >> { %4015 = vmatpush1.bf16.msra.mxu0 %v4014_v40  ;;  %v4022_v40 = vpack.c.bf16 %v5167_v60, %v5161_v57  ;;  %v6144_v25 = vld [vmem:[#allocation83_spill] sm:$0xff]  ;;  %v6145_v22 = vld [vmem:[#allocation86_spill] sm:$0xff]  ;;  %v6147_v27 = vld [vmem:[#allocation81_spill] sm:$0xff]  ;;  %vm1932_vm14 = vcmask 1046534   ;;  %vm1935_vm15 = vcmask 1047559   ;;  %vm1938_vm6 = vcmask 64512  }
 0x1bd   : >> { %4017 = vmatprep.subr.bf16.mxu0 %v4016_v41  ;;  %4046 = vmatpush3.bf16.msra.mxu1 %v4045_v46  ;;  %v4024_v41 = vpack.c.bf16 %v6142_v28, %v6141_v0  ;;  %v4051_v46 = vpack.c.bf16 %v5171_v62, %v5165_v59  ;;  %v6146_v1 = vld [vmem:[#allocation78_spill] sm:$0xff]  ;;  %v6149_v23 = vld [vmem:[#allocation85_spill] sm:$0xff]  ;;  %v6151_v16 = vld [vmem:[#allocation92_spill] sm:$0xff]  ;;  %s3634_s17 = sshll.u32 (%p839_p5), %s4789_s25, 9  ;;  %s6272_s30 = sld [smem:[#allocation170_spill]] (%p839_p5) }
 0x1be   : >> { %4047 = vmatprep.subr.bf16.mxu1 %v5952_v31  ;;  %v4054_v0 = vpack.c.bf16 %v6147_v27, %v6146_v1  ;;  %v6148_v26 = vld [vmem:[#allocation82_spill] sm:$0xff]  ;;  %v6150_v19 = vld [vmem:[#allocation89_spill] sm:$0xff]  ;;  %v6152_v24 = vld [vmem:[#allocation84_spill] sm:$0xff]  ;;  %s3378_s26 = sshll.u32 (%p839_p5), %s5405_s6, 4  ;;  %s3360_s15 = scalar_lea.sflag (%p839_p5), [#allocation7], %s5027_s13  ;;  %s5824_s26 = int_to_ptr.vmem [resolvable:$true] %s3378_s26 }
 0x1bf   : >> { %v6153_v21 = vld [vmem:[#allocation87_spill] sm:$0xff]  ;;  %v6154_v20 = vld [vmem:[#allocation88_spill] sm:$0xff]  ;;  %v6157_v10 = vld [vmem:[#allocation98_spill] sm:$0xff]  ;;  %s4544_s16 = scalar_lea.vmem (%p839_p5), %s5824_s26, 512  ;;  %p6273_p4 = scmp.ne.s32.totalorder (%p839_p5), %s5981_s4, 0 }
 0x1c0   : >> { %4019 = vmatpush1.bf16.msra.mxu0 %v4018_v43  ;;  %v4026_v43 = vpack.c.bf16 %v6143_v2, %v5173_v63  ;;  %v6155_v17 = vld [vmem:[#allocation91_spill] sm:$0xff]  ;;  %v6158_v18 = vld [vmem:[#allocation90_spill] sm:$0xff]  ;;  %v6159_v15 = vld [vmem:[#allocation93_spill] sm:$0xff]  ;;  %p4545_p12 = scmp.ne.s32.totalorder (%p839_p5), %s5824_s26, %s4544_s16  ;;  %s4681_s29 = smov (%p839_p5), [#allocation17]  }
 0x1c1   : >> { %4021 = vmatprep.subr.bf16.mxu0 %v4020_v44  ;;  %4049 = vmatpush3.bf16.msra.mxu1 %v4048_v38  ;;  %v4028_v44 = vpack.c.bf16 %v6145_v22, %v6144_v25  ;;  %v4030_v38 = vpack.c.bf16 %v6149_v23, %v6148_v26  ;;  %v6156_v13 = vld [vmem:[#allocation95_spill] sm:$0xff]  ;;  %v6160_v14 = vld [vmem:[#allocation94_spill] sm:$0xff]  ;;  %v6161_v12 = vld [vmem:[#allocation97_spill] sm:$0xff]  ;;  %s4548_s24 = sshll.u32 (%p839_p5), %s4681_s29, 4  ;;  %s4549_s24 = int_to_ptr.vmem [resolvable:$false] %s4548_s24 }
 0x1c2   : >> { %4050 = vmatprep.subr.bf16.mxu1 %v5952_v31  ;;  %v6162_v7 = vld [vmem:[#allocation101_spill] sm:$0xff]  ;;  %v6163_v4 = vld [vmem:[#allocation104_spill] sm:$0xff]  ;;  %v6165_v9 = vld [vmem:[#allocation99_spill] sm:$0xff]  ;;  %p4546_p6 = pnand (%p839_p5), %p4545_p12, %p6273_p4  ;;  %p4551_p1 = scmp.lt.s32.totalorder (%p839_p5), %s5824_s26, %s4549_s24 }
 0x1c3   : >> { %v6164_v11 = vld [vmem:[#allocation96_spill] sm:$0xff]  ;;  %v6167_v5 = vld [vmem:[#allocation103_spill] sm:$0xff]  ;;  %v6169_v39 = vld [vmem:[#allocation110_spill] sm:$0xff]  ;;  %s5821_s18 = scalar_lea.hbm (%p839_p5), %s6272_s30, %s3634_s17 }
 0x1c4   : >> { %4023 = vmatpush1.bf16.msra.mxu0 %v4022_v40  ;;  %v4032_v40 = vpack.c.bf16 %v6151_v16, %v6150_v19  ;;  %v6166_v8 = vld [vmem:[#allocation100_spill] sm:$0xff]  ;;  %v6168_v42 = vld [vmem:[#allocation107_spill] sm:$0xff]  ;;  %v6170_v49 = vld [vmem:[#allocation102_spill] sm:$0xff]  ;;  %p4547_p9 = pneg (%p839_p5), %p4546_p6 }
 0x1c5   : >> { %4025 = vmatprep.subr.bf16.mxu0 %v4024_v41  ;;  %4052 = vmatpush3.bf16.msra.mxu1 %v4051_v46  ;;  %v4057_v41 = vpack.c.bf16 %v6153_v21, %v6152_v24  ;;  %v4034_v46 = vpack.c.bf16 %v6155_v17, %v6154_v20  ;;  %v5476_v2 = vld [vmem:[#allocation3] sm:$0xff]  ;;  %v6241_v30 = vld [vmem:[#allocation140_spill] sm:$0xff] }
 0x1c6   : >> { %4053 = vmatprep.subr.bf16.mxu1 %v5952_v31  ;;  %v6240_v19 = vld [vmem:[#allocation153_spill] sm:$0xff]  ;;  %v6251_v23 = vld [vmem:[#allocation34_spill] sm:$0xff] }
 0x1c7   : >> { %v1885_v24 = vrot.slane %v6251_v23, 1  ;;  %v1888_v26 = vrot.slane %v6251_v23, 4 }
 0x1c8   : >> { %4027 = vmatpush1.bf16.msra.mxu0 %v4026_v43  ;;  %v4036_v43 = vpack.c.bf16 %v6157_v10, %v6156_v13 }
 0x1c9   : >> { %4029 = vmatprep.subr.bf16.mxu0 %v4028_v44  ;;  %4055 = vmatpush3.bf16.msra.mxu1 %v4054_v0  ;;  %v4060_v44 = vpack.c.bf16 %v6159_v15, %v6158_v18  ;;  %v4038_v0 = vpack.c.bf16 %v6161_v12, %v6160_v14  ;;  %v6194_v12 = vld [vmem:[#allocation134_spill] sm:$0xff] }
 0x1ca   : >> { %4056 = vmatprep.subr.bf16.mxu1 %v5952_v31 }
 0x1cc   : >> { %4031 = vmatpush1.bf16.msra.mxu0 %v4030_v38  ;;  %v4040_v38 = vpack.c.bf16 %v6163_v4, %v6162_v7  ;;  %v6173_v4 = vld [vmem:[#allocation109_spill] sm:$0xff] }
 0x1cd   : >> { %4033 = vmatprep.subr.bf16.mxu0 %v4032_v40  ;;  %4058 = vmatpush3.bf16.msra.mxu1 %v4057_v41  ;;  %v4063_v40 = vpack.c.bf16 %v6165_v9, %v6164_v11  ;;  %v4042_v41 = vpack.c.bf16 %v6167_v5, %v6166_v8  ;;  %v6175_v5 = vld [vmem:[#allocation116_spill] sm:$0xff] }
 0x1ce   : >> { %4059 = vmatprep.subr.bf16.mxu1 %v5952_v31  ;;  %v6191_v11 = vld [vmem:[#allocation124_spill] sm:$0xff] }
 0x1d0   : >> { %4035 = vmatpush1.bf16.msra.mxu0 %v4034_v46  ;;  %v4068_v46 = vpack.c.bf16 %v6169_v39, %v6168_v42 }
 0x1d1   : >> { %4037 = vmatprep.subr.bf16.mxu0 %v4036_v43  ;;  %4061 = vmatpush3.bf16.msra.mxu1 %v4060_v44  ;;  %v6171_v43 = vld [vmem:[#allocation105_spill] sm:$0xff]  ;;  %v6172_v44 = vld [vmem:[#allocation106_spill] sm:$0xff] }
 0x1d2   : >> { %4062 = vmatprep.subr.bf16.mxu1 %v5952_v31  ;;  %v4066_v1 = vpack.c.bf16 %v6171_v43, %v6170_v49  ;;  %v4070_v7 = vpack.c.bf16 %v6173_v4, %v6172_v44  ;;  %v6178_v49 = vld [vmem:[#allocation112_spill] sm:$0xff]  ;;  %v6180_v4 = vld [vmem:[#allocation119_spill] sm:$0xff]  ;;  %v6181_v44 = vld [vmem:[#allocation122_spill] sm:$0xff] }
 0x1d3   : >> { %v4076_v10 = vpack.c.bf16 %v6181_v44, %v6180_v4  ;;  %v6189_v4 = vld [vmem:[#allocation120_spill] sm:$0xff]  ;;  %v6190_v44 = vld [vmem:[#allocation123_spill] sm:$0xff] }
 0x1d4   : >> { %4039 = vmatpush1.bf16.msra.mxu0 %v4038_v0  ;;  %v6174_v0 = vld [vmem:[#allocation113_spill] sm:$0xff] }
 0x1d5   : >> { %4041 = vmatprep.subr.bf16.mxu0 %v4040_v38  ;;  %4064 = vmatpush3.bf16.msra.mxu1 %v4063_v40  ;;  %v4072_v8 = vpack.c.bf16 %v6175_v5, %v6174_v0  ;;  %v6176_v38 = vld [vmem:[#allocation108_spill] sm:$0xff]  ;;  %v6177_v40 = vld [vmem:[#allocation111_spill] sm:$0xff]  ;;  %v6183_v5 = vld [vmem:[#allocation114_spill] sm:$0xff] }
 0x1d6   : >> { %4065 = vmatprep.subr.bf16.mxu1 %v5952_v31  ;;  %v4101_v9 = vpack.c.bf16 %v6177_v40, %v6176_v38  ;;  %v6186_v38 = vld [vmem:[#allocation121_spill] sm:$0xff] }
 0x1d8   : >> { %4043 = vmatpush1.bf16.msra.mxu0 %v4042_v41  ;;  %v6179_v41 = vld [vmem:[#allocation115_spill] sm:$0xff] }
 0x1d9   : >> { %4069 = vmatprep.subr.bf16.mxu0 %v4068_v46  ;;  %4067 = vmatpush3.bf16.msra.mxu1 %v4066_v1  ;;  %v4074_v43 = vpack.c.bf16 %v6179_v41, %v6178_v49  ;;  %v6182_v46 = vmov 0.0   ;;  %v6184_v1 = vld [vmem:[#allocation117_spill] sm:$0xff]  ;;  %v6188_v49 = vld [vmem:[#allocation128_spill] sm:$0xff] }
 0x1da   : >> { %4100 = vmatprep.subr.bf16.mxu1 %v5952_v31  ;;  %v4104_v0 = vpack.c.bf16 %v6184_v1, %v6183_v5  ;;  %v6192_v5 = vld [vmem:[#allocation127_spill] sm:$0xff] }
 0x1db   : >> { %910 = vmatmul.mubr.f32.vlgmr.msra.gmra.mrb[0].mxu0 %v5476_v2  ;;  %v4082_v1 = vpack.c.bf16 %v6192_v5, %v6191_v11 }
 0x1dc   : >> { %4071 = vmatpush1.bf16.msra.mxu0 %v4070_v7  ;;  %1050 = vmatprep.mubr.f32.mxu0 %v6182_v46  ;;  %v6185_v7 = vld [vmem:[#allocation118_spill] sm:$0xff] }
 0x1dd   : >> { %4073 = vmatprep.subr.bf16.mxu0 %v4072_v8  ;;  %3785 = vmatmul.mubr.f32.vlgmr.msra.gmra.mrb[0].mxu1 %v5476_v2  ;;  %v4078_v40 = vpack.c.bf16 %v6186_v38, %v6185_v7  ;;  %v6187_v8 = vld [vmem:[#allocation125_spill] sm:$0xff]  ;;  %v6195_v38 = vld [vmem:[#allocation126_spill] sm:$0xff] }
 0x1de   : >> { %4102 = vmatpush3.bf16.msra.mxu1 %v4101_v9  ;;  %3819 = vmatprep.mubr.msk.f32.mxu1 %vm4677_vm8, %v6182_v46  ;;  %v4080_v41 = vpack.c.bf16 %v6188_v49, %v6187_v8  ;;  %v4107_v9 = vpack.c.bf16 %v6190_v44, %v6189_v4  ;;  %v6197_v8 = vld [vmem:[#allocation130_spill] sm:$0xff]  ;;  %v6200_v4 = vld [vmem:[#allocation141_spill] sm:$0xff]  ;;  %v6201_v44 = vld [vmem:[#allocation132_spill] sm:$0xff] }
 0x1df   : >> { %4103 = vmatprep.subr.bf16.mxu1 %v5952_v31 }
 0x1e0   : >> { %4075 = vmatpush1.bf16.msra.mxu0 %v4074_v43  ;;  %v6193_v43 = vld [vmem:[#allocation131_spill] sm:$0xff] }
 0x1e1   : >> { %4077 = vmatprep.subr.bf16.mxu0 %v4076_v10  ;;  %v4084_v7 = vpack.c.bf16 %v6194_v12, %v6193_v43  ;;  %v6196_v10 = vld [vmem:[#allocation129_spill] sm:$0xff]  ;;  %v6203_v12 = vld [vmem:[#allocation136_spill] sm:$0xff] }
 0x1e2   : >> { %4105 = vmatpush3.bf16.msra.mxu1 %v4104_v0  ;;  %v4110_v13 = vpack.c.bf16 %v6196_v10, %v6195_v38  ;;  %v6198_v0 = vld [vmem:[#allocation133_spill] sm:$0xff]  ;;  %v6206_v38 = vld [vmem:[#allocation147_spill] sm:$0xff] }
 0x1e3   : >> { %4106 = vmatprep.subr.bf16.mxu1 %v5952_v31  ;;  %v4086_v49 = vpack.c.bf16 %v6198_v0, %v6197_v8  ;;  %v6207_v8 = vld [vmem:[#allocation138_spill] sm:$0xff] }
 0x1e4   : >> { %4079 = vmatpush1.bf16.msra.mxu0 %v4078_v40  ;;  %v6199_v40 = vld [vmem:[#allocation137_spill] sm:$0xff] }
 0x1e5   : >> { %4081 = vmatprep.subr.bf16.mxu0 %v4080_v41  ;;  %v4088_v11 = vpack.c.bf16 %v6200_v4, %v6199_v40  ;;  %v6202_v41 = vld [vmem:[#allocation135_spill] sm:$0xff] }
 0x1e6   : >> { %4108 = vmatpush3.bf16.msra.mxu1 %v4107_v9  ;;  %v4113_v5 = vpack.c.bf16 %v6202_v41, %v6201_v44  ;;  %v6204_v9 = vld [vmem:[#allocation139_spill] sm:$0xff] }
 0x1e7   : >> { %4109 = vmatprep.subr.bf16.mxu1 %v5952_v31  ;;  %v4090_v43 = vpack.c.bf16 %v6204_v9, %v6203_v12  ;;  %v6209_v40 = vld [vmem:[#allocation143_spill] sm:$0xff]  ;;  %v6213_v12 = vld [vmem:[#allocation145_spill] sm:$0xff] }
 0x1e8   : >> { %4083 = vmatpush1.bf16.msra.mxu0 %v4082_v1  ;;  %v6205_v1 = vld [vmem:[#allocation144_spill] sm:$0xff]  ;;  %v6212_v44 = vld [vmem:[#allocation155_spill] sm:$0xff] }
 0x1e9   : >> { %4085 = vmatprep.subr.bf16.mxu0 %v4084_v7  ;;  %v4092_v10 = vpack.c.bf16 %v6206_v38, %v6205_v1  ;;  %v6208_v7 = vld [vmem:[#allocation142_spill] sm:$0xff]  ;;  %v6215_v1 = vld [vmem:[#allocation149_spill] sm:$0xff] }
 0x1ea   : >> { %4111 = vmatpush3.bf16.msra.mxu1 %v4110_v13  ;;  %v4116_v0 = vpack.c.bf16 %v6208_v7, %v6207_v8  ;;  %v6210_v13 = vld [vmem:[#allocation146_spill] sm:$0xff]  ;;  %v6218_v8 = vld [vmem:[#allocation156_spill] sm:$0xff] }
 0x1eb   : >> { %4112 = vmatprep.subr.bf16.mxu1 %v5952_v31  ;;  %v4094_v4 = vpack.c.bf16 %v6210_v13, %v6209_v40  ;;  %v6220_v40 = vld [vmem:[#allocation52_spill] sm:$0xff]  ;;  %v6221_v13 = vld [vmem:[#allocation53_spill] sm:$0xff] }
 0x1ec   : >> { %4087 = vmatpush1.bf16.msra.mxu0 %v4086_v49  ;;  %v6211_v49 = vld [vmem:[#allocation150_spill] sm:$0xff] }
 0x1ed   : >> { %4089 = vmatprep.subr.bf16.mxu0 %v4088_v11  ;;  %v4096_v41 = vpack.c.bf16 %v6212_v44, %v6211_v49  ;;  %v6214_v11 = vld [vmem:[#allocation148_spill] sm:$0xff]  ;;  %v6222_v49 = vld [vmem:[#allocation54_spill] sm:$0xff]  ;;  %v6223_v44 = vld [vmem:[#allocation55_spill] sm:$0xff] }
 0x1ee   : >> { %4114 = vmatpush3.bf16.msra.mxu1 %v4113_v5  ;;  %v4119_v9 = vpack.c.bf16 %v6214_v11, %v6213_v12  ;;  %v6216_v5 = vld [vmem:[#allocation152_spill] sm:$0xff]  ;;  %v6225_v11 = vld [vmem:[#allocation57_spill] sm:$0xff] }
 0x1ef   : >> { %4115 = vmatprep.subr.bf16.mxu1 %v5952_v31  ;;  %v4098_v38 = vpack.c.bf16 %v6216_v5, %v6215_v1  ;;  %v6224_v12 = vld [vmem:[#allocation56_spill] sm:$0xff]  ;;  %v6226_v1 = vld [vmem:[#allocation58_spill] sm:$0xff]  ;;  %v6227_v5 = vld [vmem:[#allocation59_spill] sm:$0xff] }
 0x1f0   : >> { %4091 = vmatpush1.bf16.msra.mxu0 %v4090_v43  ;;  %v6217_v43 = vld [vmem:[#allocation151_spill] sm:$0xff] }
 0x1f1   : >> { %4093 = vmatprep.subr.bf16.mxu0 %v4092_v10  ;;  %v4122_v7 = vpack.c.bf16 %v6218_v8, %v6217_v43  ;;  %v5537_v10 = vld [vmem:[#allocation2] sm:$0xff] }
 0x1f2   : >> { %4117 = vmatpush3.bf16.msra.mxu1 %v4116_v0  ;;  %v6219_v0 = vld [vmem:[#allocation26_spill] sm:$0xff]  ;;  %v6228_v43 = vld [vmem:[#allocation60_spill] sm:$0xff]  ;;  %v6229_v8 = vld [vmem:[#allocation61_spill] sm:$0xff] }
 0x1f3   : >> { %4118 = vmatprep.subr.bf16.mxu1 %v5952_v31 }
 0x1f4   : >> { %4095 = vmatpush1.bf16.msra.mxu0 %v4094_v4  ;;  %v4125_v4 = vpack.c.bf16 %v6221_v13, %v6220_v40  ;;  %v6230_v40 = vld [vmem:[#allocation62_spill] sm:$0xff]  ;;  %v6231_v13 = vld [vmem:[#allocation63_spill] sm:$0xff] }
 0x1f5   : >> { %4097 = vmatprep.subr.bf16.mxu0 %v4096_v41  ;;  %v4128_v41 = vpack.c.bf16 %v6223_v44, %v6222_v49  ;;  %v6232_v49 = vld [vmem:[#allocation64_spill] sm:$0xff]  ;;  %v6233_v44 = vld [vmem:[#allocation65_spill] sm:$0xff] }
 0x1f6   : >> { %4120 = vmatpush3.bf16.msra.mxu1 %v4119_v9  ;;  %v4131_v9 = vpack.c.bf16 %v6225_v11, %v6224_v12  ;;  %v6234_v12 = vld [vmem:[#allocation66_spill] sm:$0xff]  ;;  %v6235_v11 = vld [vmem:[#allocation67_spill] sm:$0xff] }
 0x1f7   : >> { %4121 = vmatprep.subr.bf16.mxu1 %v5952_v31 }
 0x1f8   : >> { %4099 = vmatpush1.bf16.msra.mxu0 %v4098_v38  ;;  %v4134_v38 = vpack.c.bf16 %v6227_v5, %v6226_v1 }
 0x1f9   : >> { %4124 = vmatprep.subr.bf16.mxu0 %v5952_v31 }
 0x1fa   : >> { %4123 = vmatpush3.bf16.msra.mxu1 %v4122_v7  ;;  %v4137_v7 = vpack.c.bf16 %v6229_v8, %v6228_v43  ;;  %v6237_v43 = vld [vmem:[#allocation157_spill] sm:$0xff] }
 0x1fb   : >> { %1051 = vmatmul.mubr.f32.vlgmr.msra.gmra.mrb[0].mxu0 %v5537_v10  ;;  %3857 = vmatprep.subr.mxu1 %v6182_v46 }
 0x1fc   : >> { %3854 = vmatprep.mubr.msk.f32.mxu0 %vm4677_vm8, %v6182_v46  ;;  %4126 = vmatpush3.bf16.msra.mxu0 %v4125_v4  ;;  %v4140_v4 = vpack.c.bf16 %v6231_v13, %v6230_v40  ;;  %v6239_v13 = vld [vmem:[#allocation159_spill] sm:$0xff] }
 0x1fd   : >> { %3820 = vmatmul.mubr.f32.vlgmr.msra.gmra.mrb[2].mxu1 %v5537_v10  ;;  %4127 = vmatprep.subr.bf16.mxu0 %v5952_v31  ;;  %v1169_v20 = vrot.slane %v6239_v13, %v6240_v19 }
 0x1fe   : >> { %3859 = vmatprep.mubr.msk.f32.mxu1 %vm4677_vm8, %v6182_v46 }
 0x200   : >> { %4129 = vmatpush3.bf16.msra.mxu0 %v4128_v41  ;;  %v4143_v41 = vpack.c.bf16 %v6233_v44, %v6232_v49 }
 0x201   : >> { %4130 = vmatprep.subr.bf16.mxu0 %v5952_v31 }
 0x203   : >> { %3858 = vmatpush3.xpose.msra.mxu1 %v6219_v0 }
 0x204   : >> { %3862 = vmatprep.subr.mxu1 %v6182_v46  ;;  %4132 = vmatpush3.bf16.msra.mxu0 %v4131_v9  ;;  %v4146_v9 = vpack.c.bf16 %v6235_v11, %v6234_v12 }
 0x205   : >> { %4133 = vmatprep.subr.bf16.mxu0 %v5952_v31 }
 0x208   : >> { %4135 = vmatpush3.bf16.msra.mxu0 %v4134_v38  ;;  %v6236_v38 = vld [vmem:[#allocation154_spill] sm:$0xff] }
 0x209   : >> { %4136 = vmatprep.subr.bf16.mxu0 %v5952_v31  ;;  %v1130_v8 = vrot.slane %v6237_v43, %v6236_v38 }
 0x20c   : >> { %4138 = vmatpush3.bf16.msra.mxu0 %v4137_v7  ;;  %v6238_v7 = vld [vmem:[#allocation158_spill] sm:$0xff] }
 0x20d   : >> { %4139 = vmatprep.subr.bf16.mxu0 %v5952_v31  ;;  %v1147_v40 = vrot.slane %v6237_v43, %v6238_v7  ;;  %v1153_v12 = vrot.slane %v6239_v13, %v6238_v7 }
 0x210   : >> { %4141 = vmatpush3.bf16.msra.mxu0 %v4140_v4  ;;  %v1136_v4 = vrot.slane %v6239_v13, %v6236_v38 }
 0x211   : >> { %4142 = vmatprep.subr.bf16.mxu0 %v5952_v31 }
 0x214   : >> { %4144 = vmatpush3.bf16.msra.mxu0 %v4143_v41 }
 0x215   : >> { %4145 = vmatprep.subr.bf16.mxu0 %v5952_v31 }
 0x218   : >> { %4147 = vmatpush3.bf16.msra.mxu0 %v4146_v9 }
 0x219   : >> { %3937 = vmatprep.subr.mxu0 %v6182_v46 }
 0x2b0   : >> { %v982_v1 = vpop.f32.mrb[0].mxu1 }
 0x2b1   : >> { %v3786_v5 = vpop.f32.mrb[1].mxu1 }
 0x2ce   : >> { %v1052_v49 = vpop.f32.mrb[0].mxu0 }
 0x2cf   : >> { %v4172_v44 = vadd.f32 %v1130_v8, %v1052_v49  ;;  %v1054_v41 = vpop.f32.mrb[1].mxu0 }
 0x2d0   : >> { %v4173_v31 = vadd.f32 %v1147_v40, %v1054_v41  ;;  %v1123_v9 = vpop.f32.mrb[2].mxu1  ;;  %v1164_v40 = vrot.slane %v6237_v43, %v6240_v19 }
 0x2d1   : >> { %v1137_v11 = vadd.f32 %v4172_v44, %v1136_v4  ;;  %v3821_v14 = vpop.f32.mrb[3].mxu1  ;;  %v1170_v4 = vadd.f32 %v1169_v20, %v1123_v9 }
 0x2d2   : >> { %v1154_v15 = vadd.f32 %v4173_v31, %v1153_v12  ;;  %v1165_v14 = vadd.f32 %v1164_v40, %v982_v1 }
 0x2d3   : >> { %v3594_v5 = vmul.f32 -1.442695, %v1137_v11 }
 0x2d4   : >> { %v3595_v16 = vmul.f32 -1.442695, %v1154_v15 }
 0x2d5   : >> { %4310 = vpow2.f32 %v3594_v5 }
 0x2d6   : >> { %4312 = vpow2.f32 %v3595_v16 }
 0x2df   : >> { %v4311_v17 = vpop.eup %4310 }
 0x2e0   : >> { %v1141_v18 = vadd.f32 1.0, %v4311_v17  ;;  %v4313_v8 = vpop.eup %4312  ;;  %v4678_v17 = vmov 1966171168  }
 0x2e1   : >> { %v1158_v49 = vadd.f32 1.0, %v4313_v8 }
 0x2e2   : >> { %4314 = vrcp.f32 %v1141_v18  ;;  %v1269_v18 = vunpack.c.l.s4 %v4678_v17  ;;  %v6245_v17 = vld [vmem:[#allocation30_spill] sm:$0xff] }
 0x2e3   : >> { %4316 = vrcp.f32 %v1158_v49  ;;  %v6242_v49 = vld [vmem:[#allocation27_spill] sm:$0xff] }
 0x2e4   : >> { %v1270_v41 = vunpack.c.0.s8 %v1269_v18 }
 0x2e6   : >> { %v1273_v20 = vsub.s32 %v1270_v41, %v6241_v30  ;;  %v6246_v41 = vld [vmem:[#allocation31_spill] sm:$0xff] }
 0x2ec   : >> { %v4315_v44 = vpop.eup %4314 }
 0x2ed   : >> { %v1171_v15 = vmul.f32 %v4315_v44, %v1170_v4  ;;  %v4317_v31 = vpop.eup %4316 }
 0x2ee   : >> { %v1174_v12 = vsub.f32 1.0, %v4317_v31  ;;  %v1176_v5 = vmul.f32 %v4317_v31, %v5537_v10 }
 0x2ef   : >> { %v1172_v16 = vadd.f32 %v1171_v15, %v1165_v14  ;;  %v6244_v14 = vld [vmem:[#allocation29_spill] sm:$0xff] }
 0x2f1   : >> { %4318 = vtanh.f32 %v1172_v16 }
 0x2fb   : >> { %v4319_v11 = vpop.eup %4318 }
 0x2fc   : >> { %v1175_v13 = vmul.f32 %v4319_v11, %v1174_v12  ;;  %v6247_v11 = vld [vmem:[#allocation32_spill] sm:$0xff] }
 0x2fe   : >> { %v1177_v9 = vadd.f32 %v1176_v5, %v1175_v13  ;;  %v6243_v13 = vld [vmem:[#allocation28_spill] sm:$0xff] }
 0x300   : >> { %3855 = vmatmul.mubr.f32.vlgmr.msra.gmra.mrb[2].mxu0 %v1177_v9  ;;  %3357 = vst [vmem:[#allocation2] sm:$0xff] %v1177_v9  ;;  %v1274_v1 = vrot.slane %v1177_v9, %v1273_v20  ;;  %1180 = vst [vmem:[%s1179_s1] sm:$0xff] %v1177_v9  ;;  %v1267_v44 = vcombine.high %v1177_v9, %v1177_v9  ;;  %s4550_s1 = scalar_lea.vmem (%p839_p5), %s4549_s24, 1024 }
 0x301   : >> { %3939 = vmatprep.mubr.msk.f32.mxu0 %vm4677_vm8, %v6182_v46  ;;  %p4552_p3 = scmp.lt.s32.totalorder (%p839_p5), %s4550_s1, %s4544_s16 }
 0x302   : >> { %v1290_v8 = vrot.slane %v1274_v1, %v1273_v20  ;;  %v1282_v40 = vcombine.high %v1274_v1, %v1274_v1  ;;  %v1281_v16 = vrot.slane %v1267_v44, %v1273_v20  ;;  %v6248_v1 = vld [vmem:[#allocation33_spill] sm:$0xff]  ;;  %v6250_v44 = vld [vmem:[#allocation160_spill] sm:$0xff] }
 0x303   : > { %p4553_p8 = por (%p839_p5), %p4552_p3, %p4551_p1 }
 0x304   : >> { %3860 = vmatmul.mubr.f32.vlgmr.msra.gmra.mrb[4].mxu1 %v1290_v8  ;;  %v1304_v10 = vrot.slane %v1282_v40, %v1273_v20  ;;  %v1312_v4 = vcombine.high %v1290_v8, %v1290_v8  ;;  %v1297_v18 = vrot.slane %v1281_v16, %v1273_v20  ;;  %v1283_v31 = vcombine.high %v1281_v16, %v1281_v16  ;;  %v6249_v40 = vld [vmem:[#allocation35_spill] sm:$0xff] }
 0x305   : >> { %3863 = vmatpush3.xpose.msra.mxu1 %v6242_v49  ;;  %3864 = vmatprep.mubr.msk.f32.mxu1 %vm4677_vm8, %v6182_v46  ;;  %p4554_p13 = pnand (%p839_p5), %p4553_p8, %p4547_p9 }
 0x306   : >> { %3867 = vmatprep.subr.mxu1 %v6182_v46  ;;  %v1314_v15 = vcombine.high %v1304_v10, %v1304_v10  ;;  %v1311_v12 = vrot.slane %v1283_v31, %v1273_v20  ;;  %v1313_v5 = vcombine.high %v1297_v18, %v1297_v18 }
 0x308   : >> { %3865 = vmatmul.mubr.f32.vlgmr.msra.gmra.mrb[6].mxu1 %v1304_v10  ;;  %v1315_v8 = vcombine.high %v1311_v12, %v1311_v12 }
 0x309   : >> { %3868 = vmatpush3.xpose.msra.mxu1 %v6243_v13  ;;  %3869 = vmatprep.mubr.msk.f32.mxu1 %vm4677_vm8, %v6182_v46 }
 0x30a   : >> { %3872 = vmatprep.subr.mxu1 %v6182_v46 }
 0x30c   : >> { %3870 = vmatmul.mubr.f32.vlgmr.msra.gmra.mrb[8].mxu1 %v1312_v4 }
 0x30d   : >> { %3873 = vmatpush3.xpose.msra.mxu1 %v6244_v14  ;;  %3874 = vmatprep.mubr.msk.f32.mxu1 %vm4677_vm8, %v6182_v46 }
 0x30e   : >> { %3877 = vmatprep.subr.mxu1 %v6182_v46 }
 0x310   : >> { %3875 = vmatmul.mubr.f32.vlgmr.msra.gmra.mrb[10].mxu1 %v1314_v15  ;;  %v2620_v15 = vrot.slane %v6250_v44, %v6236_v38 }
 0x311   : >> { %3878 = vmatpush3.xpose.msra.mxu1 %v6245_v17  ;;  %3879 = vmatprep.mubr.msk.f32.mxu1 %vm4677_vm8, %v6182_v46 }
 0x312   : >> { %3882 = vmatprep.subr.mxu1 %v6182_v46  ;;  %v2621_v31 = vmul.f32 %v2620_v15, %v1177_v9  ;;  %v1889_v9 = vrot.slane %v6251_v23, 5 }
 0x314   : >> { %3880 = vmatmul.mubr.f32.vlgmr.msra.gmra.mrb[12].mxu1 %v1297_v18 }
 0x315   : >> { %3883 = vmatpush3.xpose.msra.mxu1 %v6246_v41  ;;  %3884 = vmatprep.mubr.msk.f32.mxu1 %vm4677_vm8, %v6182_v46 }
 0x316   : >> { %3887 = vmatprep.subr.mxu1 %v6182_v46 }
 0x318   : >> { %3885 = vmatmul.mubr.f32.vlgmr.msra.gmra.mrb[14].mxu1 %v1311_v12 }
 0x319   : >> { %3888 = vmatpush3.xpose.msra.mxu1 %v6247_v11  ;;  %3889 = vmatprep.mubr.msk.f32.mxu1 %vm4677_vm8, %v6182_v46 }
 0x31a   : >> { %3892 = vmatprep.subr.mxu1 %v6182_v46 }
 0x31c   : >> { %3890 = vmatmul.mubr.f32.vlgmr.msra.gmra.mrb[16].mxu1 %v1313_v5 }
 0x31d   : >> { %3893 = vmatpush3.xpose.msra.mxu1 %v6248_v1  ;;  %3894 = vmatprep.mubr.msk.f32.mxu1 %vm4677_vm8, %v6182_v46 }
 0x31e   : >> { %3897 = vmatprep.subr.mxu1 %v6182_v46 }
 0x320   : >> { %3895 = vmatmul.mubr.f32.vlgmr.msra.gmra.mrb[18].mxu1 %v1315_v8 }
 0x321   : >> { %3898 = vmatpush3.msra.mxu1 %v6219_v0  ;;  %3899 = vmatprep.mubr.msk.f32.mxu1 %vm4677_vm8, %v6182_v46 }
 0x322   : >> { %3902 = vmatprep.subr.mxu1 %v6182_v46 }
 0x3d3   : >> { %v1253_v20 = vpop.f32.mrb[2].mxu0 }
 0x3d4   : >> { %v5627_v10 = vadd.f32 %v6249_v40, %v1253_v20  ;;  %v3856_v4 = vpop.f32.mrb[3].mxu0  ;;  %v1886_v20 = vrot.slane %v6251_v23, 2 }
 0x3d5   : >> { %v1887_v4 = vrot.slane %v6251_v23, 3 }
 0x3d6   : >> { %1257 = vmax.xlane.f32.xlu1 %v5627_v10 }
 0x3d7   : >> { %v1390_v16 = vpop.f32.mrb[4].mxu1 }
 0x3d8   : >> { %v3861_v18 = vpop.f32.mrb[5].mxu1 }
 0x3da   : >> { %2622 = vadd.xlane.f32.xlu1 %v2621_v31 }
 0x3db   : >> { %v1460_v12 = vpop.f32.mrb[6].mxu1 }
 0x3dc   : >> { %v3866_v5 = vpop.f32.mrb[7].mxu1  ;;  %v1901_v27 = vadd.f32 %v1885_v24, %v1460_v12  ;;  %v1891_v12 = vrot.slane %v6251_v23, 7 }
 0x3de   : >> { %v1916_v28 = vrot.slane %v1901_v27, 7 }
 0x3df   : >> { %v1530_v8 = vpop.f32.mrb[8].mxu1 }
 0x3e0   : >> { %v3871_v0 = vpop.f32.mrb[9].mxu1  ;;  %v1902_v15 = vadd.f32 %v1886_v20, %v1530_v8 }
 0x3e1   : >> { %v1890_v0 = vrot.slane %v6251_v23, 6 }
 0x3e2   : >> { %v1919_v38 = vrot.slane %v1902_v15, 6 }
 0x3e3   : >> { %v1600_v21 = vpop.f32.mrb[10].mxu1 }
 0x3e4   : >> { %v3876_v22 = vpop.f32.mrb[11].mxu1  ;;  %v1903_v31 = vadd.f32 %v1887_v4, %v1600_v21 }
 0x3e6   : >> { %v1922_v42 = vrot.slane %v1903_v31, 5 }
 0x3e7   : >> { %v1670_v40 = vpop.f32.mrb[12].mxu1 }
 0x3e8   : >> { %v3881_v25 = vpop.f32.mrb[13].mxu1  ;;  %v1904_v22 = vadd.f32 %v1888_v26, %v1670_v40 }
 0x3e9   : >> { %v1900_v25 = vadd.f32 %v1390_v16, %v6251_v23 }
 0x3ea   : >> { %v1925_v8 = vrot.slane %v1904_v22, 4 }
 0x3eb   : >> { %v1740_v18 = vpop.f32.mrb[14].mxu1  ;;  %v1918_v21 = vsel %vm1917_vm9, %v1916_v28, %v1900_v25 }
 0x3ec   : >> { %v3886_v5 = vpop.f32.mrb[15].mxu1  ;;  %v1905_v30 = vadd.f32 %v1889_v9, %v1740_v18  ;;  %v1921_v26 = vsel %vm1920_vm10, %v1919_v38, %v1918_v21 }
 0x3ed   : >> { %v1924_v9 = vsel %vm1923_vm11, %v1922_v42, %v1921_v26 }
 0x3ee   : >> { %v1928_v20 = vrot.slane %v1905_v30, 3 }
 0x3ef   : >> { %v1810_v39 = vpop.f32.mrb[16].mxu1 }
 0x3f0   : >> { %v1906_v43 = vadd.f32 %v1890_v0, %v1810_v39  ;;  %v3891_v24 = vpop.f32.mrb[17].mxu1  ;;  %v1927_v39 = vsel %vm1926_vm12, %v1925_v8, %v1924_v9 }
 0x3f1   : >> { %v1930_v0 = vsel %vm1929_vm13, %v1928_v20, %v1927_v39 }
 0x3f2   : >> { %v1931_v40 = vrot.slane %v1906_v43, 2 }
 0x3f3   : >> { %v1880_v4 = vpop.f32.mrb[18].mxu1 }
 0x3f4   : >> { %v1907_v18 = vadd.f32 %v1891_v12, %v1880_v4  ;;  %v3896_v16 = vpop.f32.mrb[19].mxu1  ;;  %v1933_v28 = vsel %vm1932_vm14, %v1931_v40, %v1930_v0 }
 0x3f6   : >> { %v1934_v5 = vrot.slane %v1907_v18, 1 }
 0x3f8   : >> { %v1936_v24 = vsel %vm1935_vm15, %v1934_v5, %v1933_v28 }
 0x3f9   : >> { %v1939_v38 = vsel %vm1938_vm6, %v1936_v24, -inf }
 0x3fa   : >> { %1940 = vmax.xlane.f32.xlu0 %v1939_v38 }
 0x487   : >> { %v1941_v21 = vpop.xlane.xlu0 %1940 }
 0x488   : >> { %v1943_v23 = vrot.slane %v1941_v21, 1  ;;  %v1944_v42 = vrot.slane %v1941_v21, 2  ;;  %v1945_v12 = vrot.slane %v1941_v21, 3  ;;  %v1946_v26 = vrot.slane %v1941_v21, 4 }
 0x489   : >> { %v1947_v4 = vrot.slane %v1941_v21, 5  ;;  %v1948_v16 = vrot.slane %v1941_v21, 6  ;;  %v1949_v8 = vrot.slane %v1941_v21, 7  ;;  %v1958_v9 = vsub.f32 %v1900_v25, %v1941_v21 }
 0x48a   : >> { %v1959_v45 = vsub.f32 %v1901_v27, %v1943_v23  ;;  %v1960_v47 = vsub.f32 %v1902_v15, %v1944_v42  ;;  %v1961_v20 = vsub.f32 %v1903_v31, %v1945_v12  ;;  %v1962_v39 = vsub.f32 %v1904_v22, %v1946_v26 }
 0x48b   : >> { %v1963_v48 = vsub.f32 %v1905_v30, %v1947_v4  ;;  %v1966_v40 = vmul.f32 1.442695, %v1958_v9  ;;  %v1964_v0 = vsub.f32 %v1906_v43, %v1948_v16  ;;  %v1965_v38 = vsub.f32 %v1907_v18, %v1949_v8 }
 0x48c   : >> { %v1968_v5 = vmul.f32 1.442695, %v1959_v45  ;;  %v1970_v28 = vmul.f32 1.442695, %v1960_v47  ;;  %v1972_v24 = vmul.f32 1.442695, %v1961_v20 }
 0x48d   : >> { %4320 = vpow2.f32 %v1966_v40  ;;  %v1974_v50 = vmul.f32 1.442695, %v1962_v39  ;;  %v1976_v51 = vmul.f32 1.442695, %v1963_v48  ;;  %v1978_v52 = vmul.f32 1.442695, %v1964_v0 }
 0x48e   : >> { %4322 = vpow2.f32 %v1968_v5  ;;  %v1980_v53 = vmul.f32 1.442695, %v1965_v38  ;;  %v4679_v9 = vmov 1.0  }
 0x48f   : >> { %4324 = vpow2.f32 %v1970_v28  ;;  %3938 = vmatpush3.msk.msra.mxu0 %vm813_vm1, %v4679_v9 }
 0x490   : >> { %4326 = vpow2.f32 %v1972_v24  ;;  %3947 = vmatprep.subr.mxu0 %v6182_v46 }
 0x491   : >> { %4328 = vpow2.f32 %v1974_v50 }
 0x492   : >> { %4330 = vpow2.f32 %v1976_v51 }
 0x493   : >> { %4332 = vpow2.f32 %v1978_v52 }
 0x494   : >> { %4334 = vpow2.f32 %v1980_v53 }
 0x497   : >> { %v4321_v23 = vpop.eup %4320 }
 0x498   : >> { %v4323_v27 = vpop.eup %4322 }
 0x499   : >> { %v4325_v30 = vpop.eup %4324  ;;  %v1990_v43 = vrot.slane %v4323_v27, 7 }
 0x49a   : >> { %v4327_v45 = vpop.eup %4326  ;;  %v1992_v47 = vrot.slane %v4325_v30, 6 }
 0x49b   : >> { %v4329_v15 = vpop.eup %4328  ;;  %v1991_v31 = vsel %vm1917_vm9, %v1990_v43, %v4321_v23  ;;  %v1994_v22 = vrot.slane %v4327_v45, 5 }
 0x49c   : >> { %v5649_v25 = vpop.eup %4330  ;;  %v1993_v48 = vsel %vm1920_vm10, %v1992_v47, %v1991_v31  ;;  %v1996_v18 = vrot.slane %v4329_v15, 4 }
 0x49d   : >> { %v4333_v21 = vpop.eup %4332  ;;  %v1995_v50 = vsel %vm1923_vm11, %v1994_v22, %v1993_v48  ;;  %v1998_v51 = vrot.slane %v5649_v25, 3 }
 0x49e   : >> { %v5654_v52 = vpop.eup %4334  ;;  %v1997_v53 = vsel %vm1926_vm12, %v1996_v18, %v1995_v50  ;;  %v2000_v42 = vrot.slane %v4333_v21, 2 }
 0x49f   : >> { %v1999_v12 = vsel %vm1929_vm13, %v1998_v51, %v1997_v53  ;;  %v2002_v26 = vrot.slane %v5654_v52, 1  ;;  %v2627_v53 = vrot.slane %v6250_v44, %v6238_v7 }
 0x4a0   : >> { %v2001_v4 = vsel %vm1932_vm14, %v2000_v42, %v1999_v12 }
 0x4a1   : >> { %v2003_v16 = vsel %vm1935_vm15, %v2002_v26, %v2001_v4 }
 0x4a2   : >> { %v2005_v8 = vsel %vm1938_vm6, %v2003_v16, 0.0 }
 0x4a3   : >> { %2006 = vadd.xlane.f32.xlu0 %v2005_v8 }
 0x530   : >> { %v2007_v20 = vpop.xlane.xlu0 %2006 }
 0x531   : >> { %4336 = vrcp.f32 %v2007_v20 }
 0x53b   : >> { %v4337_v39 = vpop.eup %4336 }
 0x53c   : >> { %v2025_v40 = vmul.f32 %v4337_v39, %v4321_v23  ;;  %v2010_v0 = vrot.slane %v4337_v39, 1  ;;  %v2011_v5 = vrot.slane %v4337_v39, 2  ;;  %v2013_v38 = vrot.slane %v4337_v39, 4 }
 0x53d   : >> { %v2014_v31 = vrot.slane %v4337_v39, 5  ;;  %v2016_v22 = vrot.slane %v4337_v39, 7 }
 0x53e   : >> { %3900 = vmatmul.mubr.msk.f32.vlgmr.msra.gmra.mrb[20].mxu1 %vm1938_vm6, %v2025_v40  ;;  %3940 = vmatmul.mubr.msk.f32.vlgmr.msra.gmra.mrb[4].mxu0 %vm1938_vm6, %v2025_v40  ;;  %v2026_v28 = vmul.f32 %v4323_v27, %v2010_v0  ;;  %v2027_v24 = vmul.f32 %v4325_v30, %v2011_v5  ;;  %v2029_v23 = vmul.f32 %v4329_v15, %v2013_v38  ;;  %v2012_v27 = vrot.slane %v4337_v39, 3 }
 0x53f   : >> { %3903 = vmatpush3.msra.mxu1 %v6242_v49  ;;  %3904 = vmatprep.mubr.msk.f32.mxu1 %vm4677_vm8, %v6182_v46  ;;  %v2015_v30 = vrot.slane %v4337_v39, 6  ;;  %v6253_v15 = vmov 0.0|0.0   ;;  %v2032_v48 = vmul.f32 %v5654_v52, %v2016_v22 }
 0x540   : >> { %3907 = vmatprep.subr.mxu1 %v6182_v46  ;;  %3948 = vmatpush3.msk.msra.mxu0 %vm6252_vm0, %v4679_v9  ;;  %v2028_v43 = vmul.f32 %v4327_v45, %v2012_v27  ;;  %v2030_v45 = vmul.f32 %v5649_v25, %v2014_v31  ;;  %vm6254_vm0 = vcmp.eq.s32.totalorder %v5395_v35, %v5369_v33  ;;  %v1258_v31 = vpop.xlane.xlu1 %1257 }
 0x541   : >> { %3949 = vmatprep.mubr.msk.f32.mxu0 %vm4677_vm8, %v6182_v46  ;;  %3957 = vmatprep.subr.mxu0 %v6182_v46  ;;  %v2031_v47 = vmul.f32 %v4333_v21, %v2015_v30  ;;  %v2665_v25 = vrot.slane %v6250_v44, %v6240_v19 }
 0x542   : >> { %3905 = vmatmul.mubr.msk.f32.vlgmr.msra.gmra.mrb[22].mxu1 %vm1938_vm6, %v2026_v28  ;;  %3950 = vmatmul.mubr.msk.f32.vlgmr.msra.gmra.mrb[6].mxu0 %vm1938_vm6, %v2027_v24 }
 0x543   : >> { %3908 = vmatpush3.msra.mxu1 %v6243_v13  ;;  %3909 = vmatprep.mubr.msk.f32.mxu1 %vm4677_vm8, %v6182_v46  ;;  %v2666_v18 = vmul.f32 %v2665_v25, %v5476_v2 }
 0x544   : >> { %3912 = vmatprep.subr.mxu1 %v6182_v46  ;;  %3958 = vmatpush3.msk.msra.mxu0 %vm817_vm5, %v4679_v9 }
 0x545   : >> { %3959 = vmatprep.mubr.msk.f32.mxu0 %vm4677_vm8, %v6182_v46  ;;  %3967 = vmatprep.subr.mxu0 %v6182_v46 }
 0x546   : >> { %3910 = vmatmul.mubr.msk.f32.vlgmr.msra.gmra.mrb[24].mxu1 %vm1938_vm6, %v2027_v24  ;;  %3960 = vmatmul.mubr.msk.f32.vlgmr.msra.gmra.mrb[8].mxu0 %vm1938_vm6, %v2029_v23 }
 0x547   : >> { %3913 = vmatpush3.msra.mxu1 %v6244_v14  ;;  %3914 = vmatprep.mubr.msk.f32.mxu1 %vm4677_vm8, %v6182_v46 }
 0x548   : >> { %3917 = vmatprep.subr.mxu1 %v6182_v46  ;;  %3968 = vmatpush3.msk.msra.mxu0 %vm819_vm7, %v4679_v9 }
 0x549   : >> { %3969 = vmatprep.mubr.msk.f32.mxu0 %vm4677_vm8, %v6182_v46  ;;  %4148 = vmatprep.subr.bf16.mxu0 %v6253_v15 }
 0x54a   : >> { %3915 = vmatmul.mubr.msk.f32.vlgmr.msra.gmra.mrb[26].mxu1 %vm1938_vm6, %v2028_v43  ;;  %3970 = vmatmul.mubr.msk.f32.vlgmr.msra.gmra.mrb[10].mxu0 %vm1938_vm6, %v2031_v47 }
 0x54b   : >> { %3918 = vmatpush3.msra.mxu1 %v6245_v17  ;;  %3919 = vmatprep.mubr.msk.f32.mxu1 %vm4677_vm8, %v6182_v46 }
 0x54c   : >> { %3922 = vmatprep.subr.mxu1 %v6182_v46  ;;  %4009 = vmatprep.mubr.msk.f32.mxu0 %vm4677_vm8, %v6182_v46 }
 0x54d   : >> { %2667 = vadd.xlane.f32.xlu1 %v2666_v18  ;;  %v1259_v18 = vsub.f32 %v5627_v10, %v1258_v31 }
 0x54e   : >> { %3920 = vmatmul.mubr.msk.f32.vlgmr.msra.gmra.mrb[28].mxu1 %vm1938_vm6, %v2029_v23 }
 0x54f   : >> { %3923 = vmatpush3.msra.mxu1 %v6246_v41  ;;  %3924 = vmatprep.mubr.msk.f32.mxu1 %vm4677_vm8, %v6182_v46 }
 0x550   : >> { %3927 = vmatprep.subr.mxu1 %v6182_v46 }
 0x552   : >> { %3925 = vmatmul.mubr.msk.f32.vlgmr.msra.gmra.mrb[30].mxu1 %vm1938_vm6, %v2030_v45 }
 0x553   : >> { %3928 = vmatpush3.msra.mxu1 %v6247_v11  ;;  %3929 = vmatprep.mubr.msk.f32.mxu1 %vm4677_vm8, %v6182_v46 }
 0x554   : >> { %3932 = vmatprep.subr.mxu1 %v6182_v46 }
 0x556   : >> { %3930 = vmatmul.mubr.msk.f32.vlgmr.msra.gmra.mrb[32].mxu1 %vm1938_vm6, %v2031_v47 }
 0x557   : >> { %3933 = vmatpush3.msra.mxu1 %v6248_v1  ;;  %3934 = vmatprep.mubr.msk.f32.mxu1 %vm4677_vm8, %v6182_v46 }
 0x558   : >> { %3942 = vmatprep.subr.mxu1 %v6182_v46 }
 0x55a   : >> { %3935 = vmatmul.mubr.msk.f32.vlgmr.msra.gmra.mrb[34].mxu1 %vm1938_vm6, %v2032_v48 }
 0x55b   : >> { %3943 = vmatpush3.msk.msra.mxu1 %vm814_vm3, %v4679_v9  ;;  %3944 = vmatprep.mubr.msk.f32.mxu1 %vm4677_vm8, %v6182_v46 }
 0x55c   : >> { %3952 = vmatprep.subr.mxu1 %v6182_v46 }
 0x55e   : >> { %3945 = vmatmul.mubr.msk.f32.vlgmr.msra.gmra.mrb[36].mxu1 %vm1938_vm6, %v2026_v28 }
 0x55f   : >> { %3953 = vmatpush3.msk.msra.mxu1 %vm816_vm2, %v4679_v9  ;;  %3954 = vmatprep.mubr.msk.f32.mxu1 %vm4677_vm8, %v6182_v46 }
 0x560   : >> { %3962 = vmatprep.subr.mxu1 %v6182_v46 }
 0x562   : >> { %3955 = vmatmul.mubr.msk.f32.vlgmr.msra.gmra.mrb[38].mxu1 %vm1938_vm6, %v2028_v43 }
 0x563   : >> { %3963 = vmatpush3.msk.msra.mxu1 %vm818_vm4, %v4679_v9  ;;  %3964 = vmatprep.mubr.msk.f32.mxu1 %vm4677_vm8, %v6182_v46 }
 0x564   : >> { %3972 = vmatprep.subr.mxu1 %v6182_v46 }
 0x566   : >> { %3965 = vmatmul.mubr.msk.f32.vlgmr.msra.gmra.mrb[40].mxu1 %vm1938_vm6, %v2030_v45 }
 0x567   : >> { %3973 = vmatpush3.msk.msra.mxu1 %vm6254_vm0, %v4679_v9  ;;  %3974 = vmatprep.mubr.msk.f32.mxu1 %vm4677_vm8, %v6182_v46 }
 0x56a   : >> { %3975 = vmatmul.mubr.msk.f32.vlgmr.msra.gmra.mrb[42].mxu1 %vm1938_vm6, %v2032_v48 }
 0x611   : >> { %v2102_v21 = vpop.f32.mrb[20].mxu1  ;;  %v2749_v50 = vpop.f32.mrb[4].mxu0 }
 0x612   : >> { %v3901_v51 = vpop.f32.mrb[21].mxu1  ;;  %v3941_v52 = vpop.f32.mrb[5].mxu0  ;;  %v2628_v16 = vmul.f32 %v2627_v53, %v2102_v21 }
 0x615   : >> { %v2175_v42 = vpop.f32.mrb[22].mxu1  ;;  %v2889_v12 = vpop.f32.mrb[6].mxu0 }
 0x616   : >> { %v2629_v26 = vmul.f32 %v2627_v53, %v2175_v42  ;;  %v3906_v4 = vpop.f32.mrb[23].mxu1  ;;  %v3951_v46 = vpop.f32.mrb[7].mxu0 }
 0x617   : >> { %v1260_v4 = vmul.f32 1.442695, %v1259_v18 }
 0x618   : >> { %v2644_v8 = vrot.slane %v2629_v26, 7 }
 0x619   : >> { %v2248_v20 = vpop.f32.mrb[24].mxu1  ;;  %v3029_v39 = vpop.f32.mrb[8].mxu0  ;;  %4338 = vpow2.f32 %v1260_v4 }
 0x61a   : >> { %v2645_v40 = vsel %vm1917_vm9, %v2644_v8, %v2628_v16  ;;  %v2630_v2 = vmul.f32 %v2627_v53, %v2248_v20  ;;  %v3911_v0 = vpop.f32.mrb[25].mxu1  ;;  %v3961_v5 = vpop.f32.mrb[9].mxu0 }
 0x61c   : >> { %v2646_v28 = vrot.slane %v2630_v2, 6 }
 0x61d   : >> { %v2321_v24 = vpop.f32.mrb[26].mxu1  ;;  %v3169_v38 = vpop.f32.mrb[10].mxu0 }
 0x61e   : >> { %v2647_v23 = vsel %vm1920_vm10, %v2646_v28, %v2645_v40  ;;  %v2631_v27 = vmul.f32 %v2627_v53, %v2321_v24  ;;  %v3916_v30 = vpop.f32.mrb[27].mxu1  ;;  %v3971_v43 = vpop.f32.mrb[11].mxu0  ;;  %v3267_v4 = vrot.slane %v3169_v38, 2 }
 0x620   : >> { %v2648_v47 = vrot.slane %v2631_v27, 5 }
 0x621   : >> { %v2394_v45 = vpop.f32.mrb[28].mxu1 }
 0x622   : >> { %v2649_v22 = vsel %vm1923_vm11, %v2648_v47, %v2647_v23  ;;  %v2632_v48 = vmul.f32 %v2627_v53, %v2394_v45  ;;  %v3921_v25 = vpop.f32.mrb[29].mxu1  ;;  %v3259_v47 = vrot.slane %v2889_v12, 6 }
 0x624   : >> { %v2650_v21 = vrot.slane %v2632_v48, 4  ;;  %v4339_v48 = vpop.eup %4338 }
 0x625   : >> { %v2467_v51 = vpop.f32.mrb[30].mxu1 }
 0x626   : >> { %v2651_v52 = vsel %vm1926_vm12, %v2650_v21, %v2649_v22  ;;  %v2633_v42 = vmul.f32 %v2627_v53, %v2467_v51  ;;  %v3926_v26 = vpop.f32.mrb[31].mxu1 }
 0x628   : >> { %v2652_v46 = vrot.slane %v2633_v42, 3 }
 0x629   : >> { %v2540_v16 = vpop.f32.mrb[32].mxu1 }
 0x62a   : >> { %v2634_v8 = vmul.f32 %v2627_v53, %v2540_v16  ;;  %v3931_v20 = vpop.f32.mrb[33].mxu1  ;;  %v2653_v40 = vsel %vm1929_vm13, %v2652_v46, %v2651_v52 }
 0x62c   : >> { %v2654_v2 = vrot.slane %v2634_v8, 2 }
 0x62d   : >> { %v2613_v0 = vpop.f32.mrb[34].mxu1 }
 0x62e   : >> { %v2635_v5 = vmul.f32 %v2627_v53, %v2613_v0  ;;  %v3936_v28 = vpop.f32.mrb[35].mxu1  ;;  %v2655_v10 = vsel %vm1932_vm14, %v2654_v2, %v2653_v40  ;;  %v3263_v53 = vrot.slane %v3029_v39, 4  ;;  %v4680_v40 = vmov 0   ;;  %v2623_v39 = vpop.xlane.xlu1 %2622 }
 0x62f   : >> { %4309 = vset.pattern.permute.xlu0 %v4680_v40  ;;  %4308 = vset.pattern.permute.xlu1 %v4680_v40  ;;  %v6268_v40 = vld [vmem:[#allocation48_spill] sm:$0xff] }
 0x630   : >> { %v2656_v24 = vrot.slane %v2635_v5, 1 }
 0x631   : >> { %v2819_v23 = vpop.f32.mrb[36].mxu1 }
 0x632   : >> { %v3257_v27 = vrot.slane %v2819_v23, 7  ;;  %v3946_v30 = vpop.f32.mrb[37].mxu1  ;;  %v2657_v43 = vsel %vm1935_vm15, %v2656_v24, %v2655_v10  ;;  %v2668_v0 = vpop.xlane.xlu1 %2667  ;;  %v6255_v10 = vld [vmem:[#allocation161_spill] sm:$0xff] }
 0x633   : >> { %2659 = vadd.xlane.f32.xlu0 %v2657_v43 }
 0x634   : >> { %v3258_v31 = vsel %vm1917_vm9, %v3257_v27, %v2749_v50 }
 0x635   : >> { %v2959_v45 = vpop.f32.mrb[38].mxu1  ;;  %v3260_v22 = vsel %vm1920_vm10, %v3259_v47, %v3258_v31  ;;  %v6256_v47 = vld [vmem:[#allocation36_spill] sm:$0xff]  ;;  %v6257_v31 = vld [vmem:[#allocation37_spill] sm:$0xff] }
 0x636   : >> { %v3261_v25 = vrot.slane %v2959_v45, 5  ;;  %v3956_v18 = vpop.f32.mrb[39].mxu1  ;;  %v4149_v45 = vpack.c.bf16 %v6257_v31, %v6256_v47 }
 0x637   : >> { %1262 = vadd.xlane.f32.xlu0 %v4339_v48 }
 0x638   : >> { %v3262_v21 = vsel %vm1923_vm11, %v3261_v25, %v3260_v22  ;;  %4150 = vmatpush3.bf16.msra.mxu0 %v4149_v45  ;;  %v6258_v22 = vld [vmem:[#allocation38_spill] sm:$0xff]  ;;  %v6259_v25 = vld [vmem:[#allocation39_spill] sm:$0xff] }
 0x639   : >> { %v3099_v51 = vpop.f32.mrb[40].mxu1  ;;  %v3264_v52 = vsel %vm1926_vm12, %v3263_v53, %v3262_v21  ;;  %v4152_v18 = vpack.c.bf16 %v6259_v25, %v6258_v22  ;;  %4151 = vmatprep.subr.bf16.mxu0 %v6253_v15  ;;  %v6260_v53 = vld [vmem:[#allocation40_spill] sm:$0xff]  ;;  %v6261_v21 = vld [vmem:[#allocation41_spill] sm:$0xff] }
 0x63a   : >> { %v3265_v42 = vrot.slane %v3099_v51, 3  ;;  %v3966_v26 = vpop.f32.mrb[41].mxu1  ;;  %v4155_v51 = vpack.c.bf16 %v6261_v21, %v6260_v53 }
 0x63c   : >> { %v3266_v12 = vsel %vm1929_vm13, %v3265_v42, %v3264_v52  ;;  %4153 = vmatpush3.bf16.msra.mxu0 %v4152_v18  ;;  %v6262_v52 = vld [vmem:[#allocation42_spill] sm:$0xff]  ;;  %v6263_v42 = vld [vmem:[#allocation43_spill] sm:$0xff] }
 0x63d   : >> { %v3239_v46 = vpop.f32.mrb[42].mxu1  ;;  %v3268_v50 = vsel %vm1932_vm14, %v3267_v4, %v3266_v12  ;;  %4154 = vmatprep.subr.bf16.mxu0 %v6253_v15  ;;  %v4158_v26 = vpack.c.bf16 %v6263_v42, %v6262_v52  ;;  %v6264_v4 = vld [vmem:[#allocation44_spill] sm:$0xff]  ;;  %v6265_v12 = vld [vmem:[#allocation45_spill] sm:$0xff] }
 0x63e   : >> { %v3269_v16 = vrot.slane %v3239_v46, 1  ;;  %v3976_v8 = vpop.f32.mrb[43].mxu1  ;;  %v4161_v46 = vpack.c.bf16 %v6265_v12, %v6264_v4 }
 0x640   : >> { %v3270_v20 = vsel %vm1935_vm15, %v3269_v16, %v3268_v50  ;;  %4156 = vmatpush3.bf16.msra.mxu0 %v4155_v51  ;;  %v6266_v50 = vld [vmem:[#allocation46_spill] sm:$0xff]  ;;  %v6267_v16 = vld [vmem:[#allocation47_spill] sm:$0xff] }
 0x641   : >> { %4157 = vmatprep.subr.bf16.mxu0 %v6253_v15  ;;  %v4164_v8 = vpack.c.bf16 %v6267_v16, %v6266_v50 }
 0x644   : >> { %4159 = vmatpush3.bf16.msra.mxu0 %v4158_v26 }
 0x645   : >> { %4160 = vmatprep.subr.bf16.mxu0 %v6253_v15 }
 0x648   : >> { %4162 = vmatpush3.bf16.msra.mxu0 %v4161_v46 }
 0x649   : >> { %4163 = vmatprep.subr.bf16.mxu0 %v6253_v15 }
 0x64c   : >> { %4165 = vmatpush3.bf16.msra.mxu0 %v4164_v8 }
 0x64d   : >> { %4166 = vmatprep.subr.bf16.mxu0 %v6253_v15 }
 0x6c0   : >> { %v2660_v2 = vpop.xlane.xlu0 %2659 }
 0x6c1   : >> { %v2661_v5 = vadd.f32 %v2660_v2, %v2623_v39  ;;  %v6269_v39 = vld [vmem:[#allocation49_spill] sm:$0xff] }
 0x6c2   : >> { %v4167_v2 = vpack.c.bf16 %v6269_v39, %v6268_v40 }
 0x6c3   : >> { %v2669_v28 = vadd.f32 %v2668_v0, %v2661_v5  ;;  %v6270_v0 = vld [vmem:[#allocation50_spill] sm:$0xff]  ;;  %v6271_v5 = vld [vmem:[#allocation51_spill] sm:$0xff] }
 0x6c4   : >> { %4168 = vmatpush3.bf16.msra.mxu0 %v4167_v2 }
 0x6c5   : >> { %v2676_v24 = vadd.f32 %v6255_v10, %v2669_v28  ;;  %v4170_v28 = vpack.c.bf16 %v6271_v5, %v6270_v0  ;;  %4169 = vmatprep.subr.bf16.mxu0 %v6253_v15  ;;  %v1263_v10 = vpop.xlane.xlu0 %1262 }
 0x6c7   : >> { %v3607_v38 = vmul.f32 -1.442695, %v2676_v24 }
 0x6c8   : >> { %4171 = vmatpush3.bf16.msra.mxu0 %v4170_v28 }
 0x6c9   : >> { %4340 = vpow2.f32 %v3607_v38 }
 0x6d3   : >> { %v4341_v23 = vpop.eup %4340 }
 0x6d4   : >> { %v2680_v27 = vadd.f32 1.0, %v4341_v23 }
 0x6d6   : >> { %4342 = vrcp.f32 %v2680_v27 }
 0x6d7   : >> { %4344 = vrcp.f32 %v1263_v10 }
 0x6e0   : >> { %v4343_v30 = vpop.eup %4342 }
 0x6e1   : >> { %3275 = vperm.xlu0 %4309, %v4343_v30   ;;  %v3243_v43 = vsub.f32 1.0, %v4343_v30  ;;  %v4345_v24 = vpop.eup %4344 }
 0x6e2   : >> { %v1265_v23 = vmul.f32 %v4345_v24, %v4339_v48 }
 0x6e3   : >> { %3246 = vperm.xlu1 %4308, %v3243_v43  }
 0x760   : >> { %v3276_v38 = vpop.permute.xlu0 %3275 }
 0x761   : >> { %v3278_v30 = vmul.f32 %v3276_v38, %v1265_v23 }
 0x762   : >> { %v3247_v27 = vpop.permute.xlu1 %3246 }
 0x763   : >> { %v3272_v43 = vmul.f32 %v3270_v20, %v3247_v27 }
 0x765   : >> { %v3279_v47 = vadd.f32 %v3278_v30, %v3272_v43 }
 0x767   : >> { %3282 = vmax.index.xlane.f32.xlu1 %v3279_v47  ;;  %3281 = vst [vmem:[%s3280_s28] sm:$0xff] %v3279_v47 }
 0x7f4   : >> { %v3283_v31 = vpop.xlane.xlu1 %3282 }
 0x7f5   : >> { %vm3284_vm0 = vcmp.eq.s32.totalorder %v3283_v31, %v5369_v33 }
 0x7f6   : >> { %4010 = vmatmul.mubr.msk.f32.vlgmr.msra.gmra.mrb[12].mxu0 %vm3284_vm0, %v4679_v9 }
 0x8c4   : > { %841 = sbr.rel (!%p839_p5) target bundleno = 440 (0x1b8), region = 171 }
 0x8c9   : >> { %v3353_v15 = vpop.f32.mrb[12].mxu0 }
 0x8ca   : >> { %3358 = vst [vmem:[#allocation3] sm:$0xff] %v3353_v15  ;;  %v4011_v45 = vpop.f32.mrb[13].mxu0 }
 0x8cb   : > { %4557 = shalt.err (!%p4554_p13)
}
 0x8cc   : > { %s4558_s6 = scalar_lea.hbm %s5821_s18, 512  ;;  %s4562_s19 = scalar_lea.hbm %s6272_s30, 1536 }
 0x8cd   : > { %p4559_p0 = scmp.ne.s32.totalorder %s5821_s18, %s4558_s6  ;;  %p4563_p10 = scmp.lt.u32.totalorder %s5821_s18, %s6272_s30 }
 0x8ce   : > { %p4564_p11 = scmp.lt.u32.totalorder %s4562_s19, %s4558_s6  ;;  %p4566_p12 = scmp.lt.u32.totalorder %s4558_s6, %s5821_s18 }
 0x8cf   : > { %p4560_p2 = pnand %p4559_p0, %p6273_p4 }
 0x8d0   : > { %p4565_p5 = por %p4564_p11, %p4563_p10 }
 0x8d1   : > { %p4561_p7 = pneg %p4560_p2 }
 0x8d2   : > { %p4567_p6 = por %p4566_p12, %p4565_p5 }
 0x8d4   : > { %p4568_p9 = pnand %p4567_p6, %p4561_p7 }
 0x8d6   : > { %4571 = shalt.err (!%p4568_p9)
}
 0x8d7   : > { %s4682_s16 = smov 128   ;;  %s4683_s1 = smov 8  }
 0x8d8   : > { %4202 = dma.vmem_to_hbm [thread:$0]  (%p6273_p4), %s5824_s26, 512, %s5821_s18, %s3360_s15, %s4682_s16, %s4682_s16, %s4683_s1  }
 0x8d9   : > { %s6274_s10 = sld [smem:[#allocation171_spill]]  ;;  %s3394_s29 = sshll.u32 %s5409_s12, 4  ;;  %s5861_s29 = int_to_ptr.vmem [resolvable:$true] %s3394_s29 }
 0x8da   : > { %s3365_s24 = scalar_lea.sflag [#allocation19], %s5027_s13  ;;  %s4572_s0 = scalar_lea.vmem %s5861_s29, 512 }
 0x8db   : > { %p4573_p1 = scmp.ne.s32.totalorder %s5861_s29, %s4572_s0  ;;  %s4684_s2 = smov [#allocation18]  }
 0x8dc   : > { %s4576_s18 = sshll.u32 %s4684_s2, 4  ;;  %s4577_s18 = int_to_ptr.vmem [resolvable:$false] %s4576_s18 }
 0x8dd   : > { %p4574_p3 = pnand %p4573_p1, %p6273_p4  ;;  %s4578_s25 = scalar_lea.vmem %s4577_s18, 1024 }
 0x8de   : > { %p4579_p13 = scmp.lt.s32.totalorder %s5861_s29, %s4577_s18  ;;  %p4580_p0 = scmp.lt.s32.totalorder %s4578_s25, %s4572_s0 }
 0x8df   : > { %s5858_s19 = scalar_lea.hbm %s6274_s10, %s3634_s17  ;;  %p4575_p8 = pneg %p4574_p3 }
 0x8e0   : > { %p4581_p2 = por %p4580_p0, %p4579_p13 }
 0x8e2   : > { %p4582_p7 = pnand %p4581_p2, %p4575_p8 }
 0x8e4   : > { %4585 = shalt.err (!%p4582_p7)
}
 0x8e5   : > { %s4586_s12 = scalar_lea.hbm %s5858_s19, 512  ;;  %s4590_s2 = scalar_lea.hbm %s6274_s10, 1536 }
 0x8e6   : > { %p4587_p10 = scmp.ne.s32.totalorder %s5858_s19, %s4586_s12  ;;  %p4591_p12 = scmp.lt.u32.totalorder %s5858_s19, %s6274_s10 }
 0x8e7   : > { %p4592_p6 = scmp.lt.u32.totalorder %s4590_s2, %s4586_s12  ;;  %p4594_p1 = scmp.lt.u32.totalorder %s4586_s12, %s5858_s19 }
 0x8e8   : > { %p4588_p11 = pnand %p4587_p10, %p6273_p4 }
 0x8e9   : > { %p4593_p9 = por %p4592_p6, %p4591_p12 }
 0x8ea   : > { %p4589_p5 = pneg %p4588_p11 }
 0x8eb   : > { %p4595_p3 = por %p4594_p1, %p4593_p9 }
 0x8ed   : > { %p4596_p8 = pnand %p4595_p3, %p4589_p5 }
 0x8ef   : > { %4599 = shalt.err (!%p4596_p8)
}
 0x8f0   : > { %4203 = dma.vmem_to_hbm [thread:$0]  (%p6273_p4), %s5861_s29, 512, %s5858_s19, %s3365_s24, %s4682_s16, %s4682_s16, %s4683_s1  }
 0x8f1 PF: > { %p4249_p13 = scmp.ge.s32.totalorder %s4658_s23, 2  ;;  %s3409_s0 = sand.u32 1, %s4646_s20  }
 0x8f2   : > { %p6275_p0 = scmp.ne.s32.totalorder %s5982_s14, 0  ;;  %s3410_s28 = scalar_lea.sflag [#allocation7], %s3409_s0 }
 0x8f4   : > { %p4230_p2 = pnand %p4249_p13, %p6275_p0 }
 0x8f6   : > { %4637 = dma.done.wait (!%p4230_p2), %s3410_s28, 512  }
 0x8f7   : > { %4639 = vsyncadd (!%p4230_p2), %s3410_s28, 4294966784  ;;  %s3419_s4 = scalar_lea.sflag [#allocation19], %s3409_s0 }
 0x8f8   : > { %4641 = dma.done.wait (!%p4230_p2), %s3419_s4, 512  }
 0x8f9   : > { %4643 = vsyncadd (!%p4230_p2), %s3419_s4, 4294966784  ;;  %p37_p4 = scmp.ge.s32.totalorder %s4951_s27, 5   ;;  %s6276_s20 = smov %s4650_s21 }
 0x8fa   : > { %s6277_s21 = smov %s4654_s22  ;;  %s6278_s22 = smov %s4962_s11 }
 0x8fb   : > { %s6279_s23 = smov %s4951_s27  ;;  %39 = sbr.rel (!%p37_p4) target bundleno = 21 (0x15), region = 182 }
 0x902   :  { %3424 = vsyncpa [#allocation6], 1 }
 0x903   :  { %3426 = vsyncpa [#allocation6 + $0x1], 1 }
 0x904   :  { %3427 = vsyncpa [#allocation9], 1 }
 0x905   :  { %3428 = vsyncpa [#allocation12], 1 }
 0x906   :  { %3429 = vsyncpa [#allocation15], 1 }
 0x907   :  { %3430 = vsyncpa [#allocation7], 1 }
 0x908   :  { %3432 = vsyncpa [#allocation7 + $0x1], 1 }
 0x909   :  { %3433 = vsyncpa [#allocation19], 1 }
 0x90a   :  { %3435 = vsyncpa [#allocation19 + $0x1], 1 }

</bundles_post_ra>
